<compile_context>
chip_gen: v6e
topology: v6e:2x2x1
jax: 0.10.0
libtpu: 0.0.40
codegen_flags: <defaults>
</compile_context>

<pallas_src>
import functools

import jax
import jax.numpy as jnp
from jax.experimental import pallas as pl
from jax.experimental.pallas import tpu as pltpu

# Conv config from the PyTorch module.
CIN = 3
COUT = 3
KH = 3
KW = 3
PAD = 2
STRIDE = 1


def conv2d_kernel(x_ref, w_ref, b_ref, o_ref, xp_ref, *, nb, h, w, wp, l_out):
    """One batch block per grid step.

    x_ref : (Nb, CIN, H*W)      VMEM  unpadded input, spatial flattened (lane-dense)
    w_ref : (COUT, CIN*KH*KW)   SMEM  scalar weights
    b_ref : (COUT,)             SMEM  scalar bias
    o_ref : (Nb, COUT, l_out)   VMEM  wide flat output rows (oh x wp), lane-dense
    xp_ref: (Nb, CIN, LP)       VMEM  scratch: zero-padded, flattened input
    """
    # ---- in-kernel zero padding into the flat padded scratch ----------------
    xp_ref[...] = jnp.zeros_like(xp_ref)
    for r in range(h):
        dst = (r + PAD) * wp + PAD
        xp_ref[:, :, dst:dst + w] = x_ref[:, :, r * w:(r + 1) * w]

    # ---- 27 broadcasted VPU FMAs per output channel --------------------------
    # Wide-output trick: keeping output row width = wp makes every tap a single
    # uniform static shift s = kh*wp + kw on the flattened padded axis.
    acc = [jnp.zeros((nb, l_out), dtype=jnp.float32) for _ in range(COUT)]
    for ci in range(CIN):
        for kh in range(KH):
            for kw in range(KW):
                s = kh * wp + kw                        # static shift
                slab = xp_ref[:, ci, s:s + l_out]       # (Nb, l_out) shifted slab
                t = (ci * KH + kh) * KW + kw            # matches (COUT, 27) reshape
                for co in range(COUT):
                    acc[co] = acc[co] + w_ref[co, t] * slab

    for co in range(COUT):
        o_ref[:, co, :] = (acc[co] + b_ref[co]).astype(o_ref.dtype)


def my_conv2d(x, weight, bias, *, nb_target=8):
    """x: (N, 3, H, W) float -> (N, 3, H + 2, W + 2)   (pad=2, k=3, stride=1)."""
    n, cin, h, w = x.shape
    assert cin == CIN
    hp, wp = h + 2 * PAD, w + 2 * PAD
    oh = (hp - KH) // STRIDE + 1
    ow = (wp - KW) // STRIDE + 1
    l_out = oh * wp                    # wide flat output length (garbage cols sliced later)
    lp = hp * wp + (KW - 1)            # flat padded length (covers the largest tap shift)

    # Batch blocking: amortize ~0.35us/step overhead, keep >= 2 steps for megacore.
    nb = max(1, min(nb_target, n // 2 if n >= 2 else 1))
    grid_n = (n + nb - 1) // nb
    n_pad = grid_n * nb

    x_flat = x.reshape(n, CIN, h * w)                      # free, contiguous reshape
    if n_pad != n:
        x_flat = jnp.pad(x_flat, ((0, n_pad - n), (0, 0), (0, 0)))
    w_flat = weight.reshape(COUT, CIN * KH * KW).astype(jnp.float32)
    b_flat = bias.reshape(COUT).astype(jnp.float32)

    kernel = functools.partial(conv2d_kernel, nb=nb, h=h, w=w, wp=wp, l_out=l_out)

    flops = 2 * n * COUT * CIN * KH * KW * oh * ow
    bytes_accessed = int(
        (x.size + weight.size + bias.size + n * COUT * oh * ow) * x.dtype.itemsize)

    out_wide = pl.pallas_call(
        kernel,
        out_shape=jax.ShapeDtypeStruct((n_pad, COUT, l_out), x.dtype),
        grid=(grid_n,),
        in_specs=[
            pl.BlockSpec((nb, CIN, h * w), lambda i: (i, 0, 0)),
            pl.BlockSpec(memory_space=pltpu.MemorySpace.SMEM),   # weights (3, 27)
            pl.BlockSpec(memory_space=pltpu.MemorySpace.SMEM),   # bias (3,)
        ],
        out_specs=pl.BlockSpec((nb, COUT, l_out), lambda i: (i, 0, 0)),
        scratch_shapes=[pltpu.VMEM((nb, CIN, lp), x.dtype)],
        compiler_params=pltpu.CompilerParams(
            dimension_semantics=("parallel",),
        ),
        cost_estimate=pl.CostEstimate(
            flops=flops, transcendentals=0, bytes_accessed=bytes_accessed),
    )(x_flat, w_flat, b_flat)

    # Wide flat rows -> (oh, wp) -> drop the KW-1 garbage columns.
    out = out_wide[:n].reshape(n, COUT, oh, wp)[:, :, :, :ow]
    return out


if __name__ == "__main__":
    key = jax.random.PRNGKey(0)
    kx, kw_, kb = jax.random.split(key, 3)

    # Deterministic synthetic parameters (PyTorch init shapes, not a checkpoint).
    fan_in = CIN * KH * KW
    bound = 1.0 / (fan_in ** 0.5)
    weight = jax.random.uniform(kw_, (COUT, CIN, KH, KW), jnp.float32, -bound, bound)
    bias = jax.random.uniform(kb, (COUT,), jnp.float32, -bound, bound)

    # Small NCHW input consistent with the module: batch=2, C=3, spatial=16.
    x = jax.random.normal(kx, (2, CIN, 16, 16), jnp.float32)

    out = my_conv2d(x, weight, bias)
    out = jax.block_until_ready(out)

    # Reference check against XLA conv (NCHW / OIHW).
    ref = jax.lax.conv_general_dilated(
        x, weight,
        window_strides=(STRIDE, STRIDE),
        padding=((PAD, PAD), (PAD, PAD)),
        dimension_numbers=("NCHW", "OIHW", "NCHW"),
    ) + bias.reshape(1, COUT, 1, 1)

    assert out.shape == ref.shape == (2, COUT, 18, 18)
    assert jnp.allclose(out, ref, atol=1e-4, rtol=1e-4)

    print("KERNEL_OK")
</pallas_src>

<mosaic_0001>
module attributes {stable_mosaic.version = 11 : i64} {
  func.func @conv2d_kernel(%arg0: i32, %arg1: memref<1x3x256xf32, #tpu.memory_space<vmem>>, %arg2: memref<3x27xf32, #tpu.memory_space<smem>>, %arg3: memref<3xf32, #tpu.memory_space<smem>>, %arg4: memref<1x3x360xf32, #tpu.memory_space<vmem>>, %arg5: memref<1x3x402xf32, #tpu.memory_space<vmem>>) attributes {dimension_semantics = [#tpu.dimension_semantics<parallel>], iteration_bounds = array<i64: 2>, scalar_prefetch = 0 : i64, scratch_operands = 1 : i64, tpu.core_type = #tpu.core_type<tc>, window_params = [{transform_indices = @transform_0, window_bounds = array<i64: 1, 3, 256>}, {transform_indices = @transform_1, window_bounds = array<i64: 3, 27>}, {transform_indices = @transform_2, window_bounds = array<i64: 3>}, {transform_indices = @transform_3, window_bounds = array<i64: 1, 3, 360>}]} {
    %cst = arith.constant 0.000000e+00 : f32
    %0 = vector.broadcast %cst : f32 to vector<1x3x402xf32>
    %c0 = arith.constant 0 : index
    %c0_0 = arith.constant 0 : index
    %c0_1 = arith.constant 0 : index
    %1 = vector.load %arg5[%c0, %c0_0, %c0_1] : memref<1x3x402xf32, #tpu.memory_space<vmem>>, vector<1x3x402xf32>
    tpu.vector_store %arg5[%c0, %c0_0, %c0_1], %0 {strides = array<i32>} : memref<1x3x402xf32, #tpu.memory_space<vmem>>, vector<1x3x402xf32>,
    %c0_2 = arith.constant 0 : index
    %c0_3 = arith.constant 0 : index
    %c0_4 = arith.constant 0 : index
    %2 = vector.load %arg1[%c0_2, %c0_3, %c0_4] : memref<1x3x256xf32, #tpu.memory_space<vmem>>, vector<1x3x16xf32>
    %c0_5 = arith.constant 0 : index
    %c0_6 = arith.constant 0 : index
    %c42 = arith.constant 42 : index
    %3 = vector.load %arg5[%c0_5, %c0_6, %c42] : memref<1x3x402xf32, #tpu.memory_space<vmem>>, vector<1x3x16xf32>
    tpu.vector_store %arg5[%c0_5, %c0_6, %c42], %2 {strides = array<i32>} : memref<1x3x402xf32, #tpu.memory_space<vmem>>, vector<1x3x16xf32>,
    %c0_7 = arith.constant 0 : index
    %c0_8 = arith.constant 0 : index
    %c16 = arith.constant 16 : index
    %4 = vector.load %arg1[%c0_7, %c0_8, %c16] : memref<1x3x256xf32, #tpu.memory_space<vmem>>, vector<1x3x16xf32>
    %c0_9 = arith.constant 0 : index
    %c0_10 = arith.constant 0 : index
    %c62 = arith.constant 62 : index
    %5 = vector.load %arg5[%c0_9, %c0_10, %c62] : memref<1x3x402xf32, #tpu.memory_space<vmem>>, vector<1x3x16xf32>
    tpu.vector_store %arg5[%c0_9, %c0_10, %c62], %4 {strides = array<i32>} : memref<1x3x402xf32, #tpu.memory_space<vmem>>, vector<1x3x16xf32>,
    %c0_11 = arith.constant 0 : index
    %c0_12 = arith.constant 0 : index
    %c32 = arith.constant 32 : index
    %6 = vector.load %arg1[%c0_11, %c0_12, %c32] : memref<1x3x256xf32, #tpu.memory_space<vmem>>, vector<1x3x16xf32>
    %c0_13 = arith.constant 0 : index
    %c0_14 = arith.constant 0 : index
    %c82 = arith.constant 82 : index
    %7 = vector.load %arg5[%c0_13, %c0_14, %c82] : memref<1x3x402xf32, #tpu.memory_space<vmem>>, vector<1x3x16xf32>
    tpu.vector_store %arg5[%c0_13, %c0_14, %c82], %6 {strides = array<i32>} : memref<1x3x402xf32, #tpu.memory_space<vmem>>, vector<1x3x16xf32>,
    %c0_15 = arith.constant 0 : index
    %c0_16 = arith.constant 0 : index
    %c48 = arith.constant 48 : index
    %8 = vector.load %arg1[%c0_15, %c0_16, %c48] : memref<1x3x256xf32, #tpu.memory_space<vmem>>, vector<1x3x16xf32>
    %c0_17 = arith.constant 0 : index
    %c0_18 = arith.constant 0 : index
    %c102 = arith.constant 102 : index
    %9 = vector.load %arg5[%c0_17, %c0_18, %c102] : memref<1x3x402xf32, #tpu.memory_space<vmem>>, vector<1x3x16xf32>
    tpu.vector_store %arg5[%c0_17, %c0_18, %c102], %8 {strides = array<i32>} : memref<1x3x402xf32, #tpu.memory_space<vmem>>, vector<1x3x16xf32>,
    %c0_19 = arith.constant 0 : index
    %c0_20 = arith.constant 0 : index
    %c64 = arith.constant 64 : index
    %10 = vector.load %arg1[%c0_19, %c0_20, %c64] : memref<1x3x256xf32, #tpu.memory_space<vmem>>, vector<1x3x16xf32>
    %c0_21 = arith.constant 0 : index
    %c0_22 = arith.constant 0 : index
    %c122 = arith.constant 122 : index
    %11 = vector.load %arg5[%c0_21, %c0_22, %c122] : memref<1x3x402xf32, #tpu.memory_space<vmem>>, vector<1x3x16xf32>
    tpu.vector_store %arg5[%c0_21, %c0_22, %c122], %10 {strides = array<i32>} : memref<1x3x402xf32, #tpu.memory_space<vmem>>, vector<1x3x16xf32>,
    %c0_23 = arith.constant 0 : index
    %c0_24 = arith.constant 0 : index
    %c80 = arith.constant 80 : index
    %12 = vector.load %arg1[%c0_23, %c0_24, %c80] : memref<1x3x256xf32, #tpu.memory_space<vmem>>, vector<1x3x16xf32>
    %c0_25 = arith.constant 0 : index
    %c0_26 = arith.constant 0 : index
    %c142 = arith.constant 142 : index
    %13 = vector.load %arg5[%c0_25, %c0_26, %c142] : memref<1x3x402xf32, #tpu.memory_space<vmem>>, vector<1x3x16xf32>
    tpu.vector_store %arg5[%c0_25, %c0_26, %c142], %12 {strides = array<i32>} : memref<1x3x402xf32, #tpu.memory_space<vmem>>, vector<1x3x16xf32>,
    %c0_27 = arith.constant 0 : index
    %c0_28 = arith.constant 0 : index
    %c96 = arith.constant 96 : index
    %14 = vector.load %arg1[%c0_27, %c0_28, %c96] : memref<1x3x256xf32, #tpu.memory_space<vmem>>, vector<1x3x16xf32>
    %c0_29 = arith.constant 0 : index
    %c0_30 = arith.constant 0 : index
    %c162 = arith.constant 162 : index
    %15 = vector.load %arg5[%c0_29, %c0_30, %c162] : memref<1x3x402xf32, #tpu.memory_space<vmem>>, vector<1x3x16xf32>
    tpu.vector_store %arg5[%c0_29, %c0_30, %c162], %14 {strides = array<i32>} : memref<1x3x402xf32, #tpu.memory_space<vmem>>, vector<1x3x16xf32>,
    %c0_31 = arith.constant 0 : index
    %c0_32 = arith.constant 0 : index
    %c112 = arith.constant 112 : index
    %16 = vector.load %arg1[%c0_31, %c0_32, %c112] : memref<1x3x256xf32, #tpu.memory_space<vmem>>, vector<1x3x16xf32>
    %c0_33 = arith.constant 0 : index
    %c0_34 = arith.constant 0 : index
    %c182 = arith.constant 182 : index
    %17 = vector.load %arg5[%c0_33, %c0_34, %c182] : memref<1x3x402xf32, #tpu.memory_space<vmem>>, vector<1x3x16xf32>
    tpu.vector_store %arg5[%c0_33, %c0_34, %c182], %16 {strides = array<i32>} : memref<1x3x402xf32, #tpu.memory_space<vmem>>, vector<1x3x16xf32>,
    %c0_35 = arith.constant 0 : index
    %c0_36 = arith.constant 0 : index
    %c128 = arith.constant 128 : index
    %18 = vector.load %arg1[%c0_35, %c0_36, %c128] : memref<1x3x256xf32, #tpu.memory_space<vmem>>, vector<1x3x16xf32>
    %c0_37 = arith.constant 0 : index
    %c0_38 = arith.constant 0 : index
    %c202 = arith.constant 202 : index
    %19 = vector.load %arg5[%c0_37, %c0_38, %c202] : memref<1x3x402xf32, #tpu.memory_space<vmem>>, vector<1x3x16xf32>
    tpu.vector_store %arg5[%c0_37, %c0_38, %c202], %18 {strides = array<i32>} : memref<1x3x402xf32, #tpu.memory_space<vmem>>, vector<1x3x16xf32>,
    %c0_39 = arith.constant 0 : index
    %c0_40 = arith.constant 0 : index
    %c144 = arith.constant 144 : index
    %20 = vector.load %arg1[%c0_39, %c0_40, %c144] : memref<1x3x256xf32, #tpu.memory_space<vmem>>, vector<1x3x16xf32>
    %c0_41 = arith.constant 0 : index
    %c0_42 = arith.constant 0 : index
    %c222 = arith.constant 222 : index
    %21 = vector.load %arg5[%c0_41, %c0_42, %c222] : memref<1x3x402xf32, #tpu.memory_space<vmem>>, vector<1x3x16xf32>
    tpu.vector_store %arg5[%c0_41, %c0_42, %c222], %20 {strides = array<i32>} : memref<1x3x402xf32, #tpu.memory_space<vmem>>, vector<1x3x16xf32>,
    %c0_43 = arith.constant 0 : index
    %c0_44 = arith.constant 0 : index
    %c160 = arith.constant 160 : index
    %22 = vector.load %arg1[%c0_43, %c0_44, %c160] : memref<1x3x256xf32, #tpu.memory_space<vmem>>, vector<1x3x16xf32>
    %c0_45 = arith.constant 0 : index
    %c0_46 = arith.constant 0 : index
    %c242 = arith.constant 242 : index
    %23 = vector.load %arg5[%c0_45, %c0_46, %c242] : memref<1x3x402xf32, #tpu.memory_space<vmem>>, vector<1x3x16xf32>
    tpu.vector_store %arg5[%c0_45, %c0_46, %c242], %22 {strides = array<i32>} : memref<1x3x402xf32, #tpu.memory_space<vmem>>, vector<1x3x16xf32>,
    %c0_47 = arith.constant 0 : index
    %c0_48 = arith.constant 0 : index
    %c176 = arith.constant 176 : index
    %24 = vector.load %arg1[%c0_47, %c0_48, %c176] : memref<1x3x256xf32, #tpu.memory_space<vmem>>, vector<1x3x16xf32>
    %c0_49 = arith.constant 0 : index
    %c0_50 = arith.constant 0 : index
    %c262 = arith.constant 262 : index
    %25 = vector.load %arg5[%c0_49, %c0_50, %c262] : memref<1x3x402xf32, #tpu.memory_space<vmem>>, vector<1x3x16xf32>
    tpu.vector_store %arg5[%c0_49, %c0_50, %c262], %24 {strides = array<i32>} : memref<1x3x402xf32, #tpu.memory_space<vmem>>, vector<1x3x16xf32>,
    %c0_51 = arith.constant 0 : index
    %c0_52 = arith.constant 0 : index
    %c192 = arith.constant 192 : index
    %26 = vector.load %arg1[%c0_51, %c0_52, %c192] : memref<1x3x256xf32, #tpu.memory_space<vmem>>, vector<1x3x16xf32>
    %c0_53 = arith.constant 0 : index
    %c0_54 = arith.constant 0 : index
    %c282 = arith.constant 282 : index
    %27 = vector.load %arg5[%c0_53, %c0_54, %c282] : memref<1x3x402xf32, #tpu.memory_space<vmem>>, vector<1x3x16xf32>
    tpu.vector_store %arg5[%c0_53, %c0_54, %c282], %26 {strides = array<i32>} : memref<1x3x402xf32, #tpu.memory_space<vmem>>, vector<1x3x16xf32>,
    %c0_55 = arith.constant 0 : index
    %c0_56 = arith.constant 0 : index
    %c208 = arith.constant 208 : index
    %28 = vector.load %arg1[%c0_55, %c0_56, %c208] : memref<1x3x256xf32, #tpu.memory_space<vmem>>, vector<1x3x16xf32>
    %c0_57 = arith.constant 0 : index
    %c0_58 = arith.constant 0 : index
    %c302 = arith.constant 302 : index
    %29 = vector.load %arg5[%c0_57, %c0_58, %c302] : memref<1x3x402xf32, #tpu.memory_space<vmem>>, vector<1x3x16xf32>
    tpu.vector_store %arg5[%c0_57, %c0_58, %c302], %28 {strides = array<i32>} : memref<1x3x402xf32, #tpu.memory_space<vmem>>, vector<1x3x16xf32>,
    %c0_59 = arith.constant 0 : index
    %c0_60 = arith.constant 0 : index
    %c224 = arith.constant 224 : index
    %30 = vector.load %arg1[%c0_59, %c0_60, %c224] : memref<1x3x256xf32, #tpu.memory_space<vmem>>, vector<1x3x16xf32>
    %c0_61 = arith.constant 0 : index
    %c0_62 = arith.constant 0 : index
    %c322 = arith.constant 322 : index
    %31 = vector.load %arg5[%c0_61, %c0_62, %c322] : memref<1x3x402xf32, #tpu.memory_space<vmem>>, vector<1x3x16xf32>
    tpu.vector_store %arg5[%c0_61, %c0_62, %c322], %30 {strides = array<i32>} : memref<1x3x402xf32, #tpu.memory_space<vmem>>, vector<1x3x16xf32>,
    %c0_63 = arith.constant 0 : index
    %c0_64 = arith.constant 0 : index
    %c240 = arith.constant 240 : index
    %32 = vector.load %arg1[%c0_63, %c0_64, %c240] : memref<1x3x256xf32, #tpu.memory_space<vmem>>, vector<1x3x16xf32>
    %c0_65 = arith.constant 0 : index
    %c0_66 = arith.constant 0 : index
    %c342 = arith.constant 342 : index
    %33 = vector.load %arg5[%c0_65, %c0_66, %c342] : memref<1x3x402xf32, #tpu.memory_space<vmem>>, vector<1x3x16xf32>
    tpu.vector_store %arg5[%c0_65, %c0_66, %c342], %32 {strides = array<i32>} : memref<1x3x402xf32, #tpu.memory_space<vmem>>, vector<1x3x16xf32>,
    %cst_67 = arith.constant 0.000000e+00 : f32
    %34 = vector.broadcast %cst_67 : f32 to vector<1x360xf32>
    %cst_68 = arith.constant 0.000000e+00 : f32
    %35 = vector.broadcast %cst_68 : f32 to vector<1x360xf32>
    %cst_69 = arith.constant 0.000000e+00 : f32
    %36 = vector.broadcast %cst_69 : f32 to vector<1x360xf32>
    %c0_70 = arith.constant 0 : index
    %c0_71 = arith.constant 0 : index
    %c0_72 = arith.constant 0 : index
    %37 = vector.load %arg5[%c0_70, %c0_71, %c0_72] : memref<1x3x402xf32, #tpu.memory_space<vmem>>, vector<1x1x360xf32>
    %38 = vector.shape_cast %37 : vector<1x1x360xf32> to vector<1x360xf32>
    %c0_73 = arith.constant 0 : index
    %c0_74 = arith.constant 0 : index
    %39 = memref.load %arg2[%c0_73, %c0_74] : memref<3x27xf32, #tpu.memory_space<smem>>
    %40 = vector.broadcast %39 : f32 to vector<1x360xf32>
    %41 = arith.mulf %40, %38 : vector<1x360xf32>
    %42 = arith.addf %34, %41 : vector<1x360xf32>
    %c1 = arith.constant 1 : index
    %c0_75 = arith.constant 0 : index
    %43 = memref.load %arg2[%c1, %c0_75] : memref<3x27xf32, #tpu.memory_space<smem>>
    %44 = vector.broadcast %43 : f32 to vector<1x360xf32>
    %45 = arith.mulf %44, %38 : vector<1x360xf32>
    %46 = arith.addf %35, %45 : vector<1x360xf32>
    %c2 = arith.constant 2 : index
    %c0_76 = arith.constant 0 : index
    %47 = memref.load %arg2[%c2, %c0_76] : memref<3x27xf32, #tpu.memory_space<smem>>
    %48 = vector.broadcast %47 : f32 to vector<1x360xf32>
    %49 = arith.mulf %48, %38 : vector<1x360xf32>
    %50 = arith.addf %36, %49 : vector<1x360xf32>
    %c0_77 = arith.constant 0 : index
    %c0_78 = arith.constant 0 : index
    %c1_79 = arith.constant 1 : index
    %51 = vector.load %arg5[%c0_77, %c0_78, %c1_79] : memref<1x3x402xf32, #tpu.memory_space<vmem>>, vector<1x1x360xf32>
    %52 = vector.shape_cast %51 : vector<1x1x360xf32> to vector<1x360xf32>
    %c0_80 = arith.constant 0 : index
    %c1_81 = arith.constant 1 : index
    %53 = memref.load %arg2[%c0_80, %c1_81] : memref<3x27xf32, #tpu.memory_space<smem>>
    %54 = vector.broadcast %53 : f32 to vector<1x360xf32>
    %55 = arith.mulf %54, %52 : vector<1x360xf32>
    %56 = arith.addf %42, %55 : vector<1x360xf32>
    %c1_82 = arith.constant 1 : index
    %c1_83 = arith.constant 1 : index
    %57 = memref.load %arg2[%c1_82, %c1_83] : memref<3x27xf32, #tpu.memory_space<smem>>
    %58 = vector.broadcast %57 : f32 to vector<1x360xf32>
    %59 = arith.mulf %58, %52 : vector<1x360xf32>
    %60 = arith.addf %46, %59 : vector<1x360xf32>
    %c2_84 = arith.constant 2 : index
    %c1_85 = arith.constant 1 : index
    %61 = memref.load %arg2[%c2_84, %c1_85] : memref<3x27xf32, #tpu.memory_space<smem>>
    %62 = vector.broadcast %61 : f32 to vector<1x360xf32>
    %63 = arith.mulf %62, %52 : vector<1x360xf32>
    %64 = arith.addf %50, %63 : vector<1x360xf32>
    %c0_86 = arith.constant 0 : index
    %c0_87 = arith.constant 0 : index
    %c2_88 = arith.constant 2 : index
    %65 = vector.load %arg5[%c0_86, %c0_87, %c2_88] : memref<1x3x402xf32, #tpu.memory_space<vmem>>, vector<1x1x360xf32>
    %66 = vector.shape_cast %65 : vector<1x1x360xf32> to vector<1x360xf32>
    %c0_89 = arith.constant 0 : index
    %c2_90 = arith.constant 2 : index
    %67 = memref.load %arg2[%c0_89, %c2_90] : memref<3x27xf32, #tpu.memory_space<smem>>
    %68 = vector.broadcast %67 : f32 to vector<1x360xf32>
    %69 = arith.mulf %68, %66 : vector<1x360xf32>
    %70 = arith.addf %56, %69 : vector<1x360xf32>
    %c1_91 = arith.constant 1 : index
    %c2_92 = arith.constant 2 : index
    %71 = memref.load %arg2[%c1_91, %c2_92] : memref<3x27xf32, #tpu.memory_space<smem>>
    %72 = vector.broadcast %71 : f32 to vector<1x360xf32>
    %73 = arith.mulf %72, %66 : vector<1x360xf32>
    %74 = arith.addf %60, %73 : vector<1x360xf32>
    %c2_93 = arith.constant 2 : index
    %c2_94 = arith.constant 2 : index
    %75 = memref.load %arg2[%c2_93, %c2_94] : memref<3x27xf32, #tpu.memory_space<smem>>
    %76 = vector.broadcast %75 : f32 to vector<1x360xf32>
    %77 = arith.mulf %76, %66 : vector<1x360xf32>
    %78 = arith.addf %64, %77 : vector<1x360xf32>
    %c0_95 = arith.constant 0 : index
    %c0_96 = arith.constant 0 : index
    %c20 = arith.constant 20 : index
    %79 = vector.load %arg5[%c0_95, %c0_96, %c20] : memref<1x3x402xf32, #tpu.memory_space<vmem>>, vector<1x1x360xf32>
    %80 = vector.shape_cast %79 : vector<1x1x360xf32> to vector<1x360xf32>
    %c0_97 = arith.constant 0 : index
    %c3 = arith.constant 3 : index
    %81 = memref.load %arg2[%c0_97, %c3] : memref<3x27xf32, #tpu.memory_space<smem>>
    %82 = vector.broadcast %81 : f32 to vector<1x360xf32>
    %83 = arith.mulf %82, %80 : vector<1x360xf32>
    %84 = arith.addf %70, %83 : vector<1x360xf32>
    %c1_98 = arith.constant 1 : index
    %c3_99 = arith.constant 3 : index
    %85 = memref.load %arg2[%c1_98, %c3_99] : memref<3x27xf32, #tpu.memory_space<smem>>
    %86 = vector.broadcast %85 : f32 to vector<1x360xf32>
    %87 = arith.mulf %86, %80 : vector<1x360xf32>
    %88 = arith.addf %74, %87 : vector<1x360xf32>
    %c2_100 = arith.constant 2 : index
    %c3_101 = arith.constant 3 : index
    %89 = memref.load %arg2[%c2_100, %c3_101] : memref<3x27xf32, #tpu.memory_space<smem>>
    %90 = vector.broadcast %89 : f32 to vector<1x360xf32>
    %91 = arith.mulf %90, %80 : vector<1x360xf32>
    %92 = arith.addf %78, %91 : vector<1x360xf32>
    %c0_102 = arith.constant 0 : index
    %c0_103 = arith.constant 0 : index
    %c21 = arith.constant 21 : index
    %93 = vector.load %arg5[%c0_102, %c0_103, %c21] : memref<1x3x402xf32, #tpu.memory_space<vmem>>, vector<1x1x360xf32>
    %94 = vector.shape_cast %93 : vector<1x1x360xf32> to vector<1x360xf32>
    %c0_104 = arith.constant 0 : index
    %c4 = arith.constant 4 : index
    %95 = memref.load %arg2[%c0_104, %c4] : memref<3x27xf32, #tpu.memory_space<smem>>
    %96 = vector.broadcast %95 : f32 to vector<1x360xf32>
    %97 = arith.mulf %96, %94 : vector<1x360xf32>
    %98 = arith.addf %84, %97 : vector<1x360xf32>
    %c1_105 = arith.constant 1 : index
    %c4_106 = arith.constant 4 : index
    %99 = memref.load %arg2[%c1_105, %c4_106] : memref<3x27xf32, #tpu.memory_space<smem>>
    %100 = vector.broadcast %99 : f32 to vector<1x360xf32>
    %101 = arith.mulf %100, %94 : vector<1x360xf32>
    %102 = arith.addf %88, %101 : vector<1x360xf32>
    %c2_107 = arith.constant 2 : index
    %c4_108 = arith.constant 4 : index
    %103 = memref.load %arg2[%c2_107, %c4_108] : memref<3x27xf32, #tpu.memory_space<smem>>
    %104 = vector.broadcast %103 : f32 to vector<1x360xf32>
    %105 = arith.mulf %104, %94 : vector<1x360xf32>
    %106 = arith.addf %92, %105 : vector<1x360xf32>
    %c0_109 = arith.constant 0 : index
    %c0_110 = arith.constant 0 : index
    %c22 = arith.constant 22 : index
    %107 = vector.load %arg5[%c0_109, %c0_110, %c22] : memref<1x3x402xf32, #tpu.memory_space<vmem>>, vector<1x1x360xf32>
    %108 = vector.shape_cast %107 : vector<1x1x360xf32> to vector<1x360xf32>
    %c0_111 = arith.constant 0 : index
    %c5 = arith.constant 5 : index
    %109 = memref.load %arg2[%c0_111, %c5] : memref<3x27xf32, #tpu.memory_space<smem>>
    %110 = vector.broadcast %109 : f32 to vector<1x360xf32>
    %111 = arith.mulf %110, %108 : vector<1x360xf32>
    %112 = arith.addf %98, %111 : vector<1x360xf32>
    %c1_112 = arith.constant 1 : index
    %c5_113 = arith.constant 5 : index
    %113 = memref.load %arg2[%c1_112, %c5_113] : memref<3x27xf32, #tpu.memory_space<smem>>
    %114 = vector.broadcast %113 : f32 to vector<1x360xf32>
    %115 = arith.mulf %114, %108 : vector<1x360xf32>
    %116 = arith.addf %102, %115 : vector<1x360xf32>
    %c2_114 = arith.constant 2 : index
    %c5_115 = arith.constant 5 : index
    %117 = memref.load %arg2[%c2_114, %c5_115] : memref<3x27xf32, #tpu.memory_space<smem>>
    %118 = vector.broadcast %117 : f32 to vector<1x360xf32>
    %119 = arith.mulf %118, %108 : vector<1x360xf32>
    %120 = arith.addf %106, %119 : vector<1x360xf32>
    %c0_116 = arith.constant 0 : index
    %c0_117 = arith.constant 0 : index
    %c40 = arith.constant 40 : index
    %121 = vector.load %arg5[%c0_116, %c0_117, %c40] : memref<1x3x402xf32, #tpu.memory_space<vmem>>, vector<1x1x360xf32>
    %122 = vector.shape_cast %121 : vector<1x1x360xf32> to vector<1x360xf32>
    %c0_118 = arith.constant 0 : index
    %c6 = arith.constant 6 : index
    %123 = memref.load %arg2[%c0_118, %c6] : memref<3x27xf32, #tpu.memory_space<smem>>
    %124 = vector.broadcast %123 : f32 to vector<1x360xf32>
    %125 = arith.mulf %124, %122 : vector<1x360xf32>
    %126 = arith.addf %112, %125 : vector<1x360xf32>
    %c1_119 = arith.constant 1 : index
    %c6_120 = arith.constant 6 : index
    %127 = memref.load %arg2[%c1_119, %c6_120] : memref<3x27xf32, #tpu.memory_space<smem>>
    %128 = vector.broadcast %127 : f32 to vector<1x360xf32>
    %129 = arith.mulf %128, %122 : vector<1x360xf32>
    %130 = arith.addf %116, %129 : vector<1x360xf32>
    %c2_121 = arith.constant 2 : index
    %c6_122 = arith.constant 6 : index
    %131 = memref.load %arg2[%c2_121, %c6_122] : memref<3x27xf32, #tpu.memory_space<smem>>
    %132 = vector.broadcast %131 : f32 to vector<1x360xf32>
    %133 = arith.mulf %132, %122 : vector<1x360xf32>
    %134 = arith.addf %120, %133 : vector<1x360xf32>
    %c0_123 = arith.constant 0 : index
    %c0_124 = arith.constant 0 : index
    %c41 = arith.constant 41 : index
    %135 = vector.load %arg5[%c0_123, %c0_124, %c41] : memref<1x3x402xf32, #tpu.memory_space<vmem>>, vector<1x1x360xf32>
    %136 = vector.shape_cast %135 : vector<1x1x360xf32> to vector<1x360xf32>
    %c0_125 = arith.constant 0 : index
    %c7 = arith.constant 7 : index
    %137 = memref.load %arg2[%c0_125, %c7] : memref<3x27xf32, #tpu.memory_space<smem>>
    %138 = vector.broadcast %137 : f32 to vector<1x360xf32>
    %139 = arith.mulf %138, %136 : vector<1x360xf32>
    %140 = arith.addf %126, %139 : vector<1x360xf32>
    %c1_126 = arith.constant 1 : index
    %c7_127 = arith.constant 7 : index
    %141 = memref.load %arg2[%c1_126, %c7_127] : memref<3x27xf32, #tpu.memory_space<smem>>
    %142 = vector.broadcast %141 : f32 to vector<1x360xf32>
    %143 = arith.mulf %142, %136 : vector<1x360xf32>
    %144 = arith.addf %130, %143 : vector<1x360xf32>
    %c2_128 = arith.constant 2 : index
    %c7_129 = arith.constant 7 : index
    %145 = memref.load %arg2[%c2_128, %c7_129] : memref<3x27xf32, #tpu.memory_space<smem>>
    %146 = vector.broadcast %145 : f32 to vector<1x360xf32>
    %147 = arith.mulf %146, %136 : vector<1x360xf32>
    %148 = arith.addf %134, %147 : vector<1x360xf32>
    %c0_130 = arith.constant 0 : index
    %c0_131 = arith.constant 0 : index
    %c42_132 = arith.constant 42 : index
    %149 = vector.load %arg5[%c0_130, %c0_131, %c42_132] : memref<1x3x402xf32, #tpu.memory_space<vmem>>, vector<1x1x360xf32>
    %150 = vector.shape_cast %149 : vector<1x1x360xf32> to vector<1x360xf32>
    %c0_133 = arith.constant 0 : index
    %c8 = arith.constant 8 : index
    %151 = memref.load %arg2[%c0_133, %c8] : memref<3x27xf32, #tpu.memory_space<smem>>
    %152 = vector.broadcast %151 : f32 to vector<1x360xf32>
    %153 = arith.mulf %152, %150 : vector<1x360xf32>
    %154 = arith.addf %140, %153 : vector<1x360xf32>
    %c1_134 = arith.constant 1 : index
    %c8_135 = arith.constant 8 : index
    %155 = memref.load %arg2[%c1_134, %c8_135] : memref<3x27xf32, #tpu.memory_space<smem>>
    %156 = vector.broadcast %155 : f32 to vector<1x360xf32>
    %157 = arith.mulf %156, %150 : vector<1x360xf32>
    %158 = arith.addf %144, %157 : vector<1x360xf32>
    %c2_136 = arith.constant 2 : index
    %c8_137 = arith.constant 8 : index
    %159 = memref.load %arg2[%c2_136, %c8_137] : memref<3x27xf32, #tpu.memory_space<smem>>
    %160 = vector.broadcast %159 : f32 to vector<1x360xf32>
    %161 = arith.mulf %160, %150 : vector<1x360xf32>
    %162 = arith.addf %148, %161 : vector<1x360xf32>
    %c0_138 = arith.constant 0 : index
    %c1_139 = arith.constant 1 : index
    %c0_140 = arith.constant 0 : index
    %163 = vector.load %arg5[%c0_138, %c1_139, %c0_140] : memref<1x3x402xf32, #tpu.memory_space<vmem>>, vector<1x1x360xf32>
    %164 = vector.shape_cast %163 : vector<1x1x360xf32> to vector<1x360xf32>
    %c0_141 = arith.constant 0 : index
    %c9 = arith.constant 9 : index
    %165 = memref.load %arg2[%c0_141, %c9] : memref<3x27xf32, #tpu.memory_space<smem>>
    %166 = vector.broadcast %165 : f32 to vector<1x360xf32>
    %167 = arith.mulf %166, %164 : vector<1x360xf32>
    %168 = arith.addf %154, %167 : vector<1x360xf32>
    %c1_142 = arith.constant 1 : index
    %c9_143 = arith.constant 9 : index
    %169 = memref.load %arg2[%c1_142, %c9_143] : memref<3x27xf32, #tpu.memory_space<smem>>
    %170 = vector.broadcast %169 : f32 to vector<1x360xf32>
    %171 = arith.mulf %170, %164 : vector<1x360xf32>
    %172 = arith.addf %158, %171 : vector<1x360xf32>
    %c2_144 = arith.constant 2 : index
    %c9_145 = arith.constant 9 : index
    %173 = memref.load %arg2[%c2_144, %c9_145] : memref<3x27xf32, #tpu.memory_space<smem>>
    %174 = vector.broadcast %173 : f32 to vector<1x360xf32>
    %175 = arith.mulf %174, %164 : vector<1x360xf32>
    %176 = arith.addf %162, %175 : vector<1x360xf32>
    %c0_146 = arith.constant 0 : index
    %c1_147 = arith.constant 1 : index
    %c1_148 = arith.constant 1 : index
    %177 = vector.load %arg5[%c0_146, %c1_147, %c1_148] : memref<1x3x402xf32, #tpu.memory_space<vmem>>, vector<1x1x360xf32>
    %178 = vector.shape_cast %177 : vector<1x1x360xf32> to vector<1x360xf32>
    %c0_149 = arith.constant 0 : index
    %c10 = arith.constant 10 : index
    %179 = memref.load %arg2[%c0_149, %c10] : memref<3x27xf32, #tpu.memory_space<smem>>
    %180 = vector.broadcast %179 : f32 to vector<1x360xf32>
    %181 = arith.mulf %180, %178 : vector<1x360xf32>
    %182 = arith.addf %168, %181 : vector<1x360xf32>
    %c1_150 = arith.constant 1 : index
    %c10_151 = arith.constant 10 : index
    %183 = memref.load %arg2[%c1_150, %c10_151] : memref<3x27xf32, #tpu.memory_space<smem>>
    %184 = vector.broadcast %183 : f32 to vector<1x360xf32>
    %185 = arith.mulf %184, %178 : vector<1x360xf32>
    %186 = arith.addf %172, %185 : vector<1x360xf32>
    %c2_152 = arith.constant 2 : index
    %c10_153 = arith.constant 10 : index
    %187 = memref.load %arg2[%c2_152, %c10_153] : memref<3x27xf32, #tpu.memory_space<smem>>
    %188 = vector.broadcast %187 : f32 to vector<1x360xf32>
    %189 = arith.mulf %188, %178 : vector<1x360xf32>
    %190 = arith.addf %176, %189 : vector<1x360xf32>
    %c0_154 = arith.constant 0 : index
    %c1_155 = arith.constant 1 : index
    %c2_156 = arith.constant 2 : index
    %191 = vector.load %arg5[%c0_154, %c1_155, %c2_156] : memref<1x3x402xf32, #tpu.memory_space<vmem>>, vector<1x1x360xf32>
    %192 = vector.shape_cast %191 : vector<1x1x360xf32> to vector<1x360xf32>
    %c0_157 = arith.constant 0 : index
    %c11 = arith.constant 11 : index
    %193 = memref.load %arg2[%c0_157, %c11] : memref<3x27xf32, #tpu.memory_space<smem>>
    %194 = vector.broadcast %193 : f32 to vector<1x360xf32>
    %195 = arith.mulf %194, %192 : vector<1x360xf32>
    %196 = arith.addf %182, %195 : vector<1x360xf32>
    %c1_158 = arith.constant 1 : index
    %c11_159 = arith.constant 11 : index
    %197 = memref.load %arg2[%c1_158, %c11_159] : memref<3x27xf32, #tpu.memory_space<smem>>
    %198 = vector.broadcast %197 : f32 to vector<1x360xf32>
    %199 = arith.mulf %198, %192 : vector<1x360xf32>
    %200 = arith.addf %186, %199 : vector<1x360xf32>
    %c2_160 = arith.constant 2 : index
    %c11_161 = arith.constant 11 : index
    %201 = memref.load %arg2[%c2_160, %c11_161] : memref<3x27xf32, #tpu.memory_space<smem>>
    %202 = vector.broadcast %201 : f32 to vector<1x360xf32>
    %203 = arith.mulf %202, %192 : vector<1x360xf32>
    %204 = arith.addf %190, %203 : vector<1x360xf32>
    %c0_162 = arith.constant 0 : index
    %c1_163 = arith.constant 1 : index
    %c20_164 = arith.constant 20 : index
    %205 = vector.load %arg5[%c0_162, %c1_163, %c20_164] : memref<1x3x402xf32, #tpu.memory_space<vmem>>, vector<1x1x360xf32>
    %206 = vector.shape_cast %205 : vector<1x1x360xf32> to vector<1x360xf32>
    %c0_165 = arith.constant 0 : index
    %c12 = arith.constant 12 : index
    %207 = memref.load %arg2[%c0_165, %c12] : memref<3x27xf32, #tpu.memory_space<smem>>
    %208 = vector.broadcast %207 : f32 to vector<1x360xf32>
    %209 = arith.mulf %208, %206 : vector<1x360xf32>
    %210 = arith.addf %196, %209 : vector<1x360xf32>
    %c1_166 = arith.constant 1 : index
    %c12_167 = arith.constant 12 : index
    %211 = memref.load %arg2[%c1_166, %c12_167] : memref<3x27xf32, #tpu.memory_space<smem>>
    %212 = vector.broadcast %211 : f32 to vector<1x360xf32>
    %213 = arith.mulf %212, %206 : vector<1x360xf32>
    %214 = arith.addf %200, %213 : vector<1x360xf32>
    %c2_168 = arith.constant 2 : index
    %c12_169 = arith.constant 12 : index
    %215 = memref.load %arg2[%c2_168, %c12_169] : memref<3x27xf32, #tpu.memory_space<smem>>
    %216 = vector.broadcast %215 : f32 to vector<1x360xf32>
    %217 = arith.mulf %216, %206 : vector<1x360xf32>
    %218 = arith.addf %204, %217 : vector<1x360xf32>
    %c0_170 = arith.constant 0 : index
    %c1_171 = arith.constant 1 : index
    %c21_172 = arith.constant 21 : index
    %219 = vector.load %arg5[%c0_170, %c1_171, %c21_172] : memref<1x3x402xf32, #tpu.memory_space<vmem>>, vector<1x1x360xf32>
    %220 = vector.shape_cast %219 : vector<1x1x360xf32> to vector<1x360xf32>
    %c0_173 = arith.constant 0 : index
    %c13 = arith.constant 13 : index
    %221 = memref.load %arg2[%c0_173, %c13] : memref<3x27xf32, #tpu.memory_space<smem>>
    %222 = vector.broadcast %221 : f32 to vector<1x360xf32>
    %223 = arith.mulf %222, %220 : vector<1x360xf32>
    %224 = arith.addf %210, %223 : vector<1x360xf32>
    %c1_174 = arith.constant 1 : index
    %c13_175 = arith.constant 13 : index
    %225 = memref.load %arg2[%c1_174, %c13_175] : memref<3x27xf32, #tpu.memory_space<smem>>
    %226 = vector.broadcast %225 : f32 to vector<1x360xf32>
    %227 = arith.mulf %226, %220 : vector<1x360xf32>
    %228 = arith.addf %214, %227 : vector<1x360xf32>
    %c2_176 = arith.constant 2 : index
    %c13_177 = arith.constant 13 : index
    %229 = memref.load %arg2[%c2_176, %c13_177] : memref<3x27xf32, #tpu.memory_space<smem>>
    %230 = vector.broadcast %229 : f32 to vector<1x360xf32>
    %231 = arith.mulf %230, %220 : vector<1x360xf32>
    %232 = arith.addf %218, %231 : vector<1x360xf32>
    %c0_178 = arith.constant 0 : index
    %c1_179 = arith.constant 1 : index
    %c22_180 = arith.constant 22 : index
    %233 = vector.load %arg5[%c0_178, %c1_179, %c22_180] : memref<1x3x402xf32, #tpu.memory_space<vmem>>, vector<1x1x360xf32>
    %234 = vector.shape_cast %233 : vector<1x1x360xf32> to vector<1x360xf32>
    %c0_181 = arith.constant 0 : index
    %c14 = arith.constant 14 : index
    %235 = memref.load %arg2[%c0_181, %c14] : memref<3x27xf32, #tpu.memory_space<smem>>
    %236 = vector.broadcast %235 : f32 to vector<1x360xf32>
    %237 = arith.mulf %236, %234 : vector<1x360xf32>
    %238 = arith.addf %224, %237 : vector<1x360xf32>
    %c1_182 = arith.constant 1 : index
    %c14_183 = arith.constant 14 : index
    %239 = memref.load %arg2[%c1_182, %c14_183] : memref<3x27xf32, #tpu.memory_space<smem>>
    %240 = vector.broadcast %239 : f32 to vector<1x360xf32>
    %241 = arith.mulf %240, %234 : vector<1x360xf32>
    %242 = arith.addf %228, %241 : vector<1x360xf32>
    %c2_184 = arith.constant 2 : index
    %c14_185 = arith.constant 14 : index
    %243 = memref.load %arg2[%c2_184, %c14_185] : memref<3x27xf32, #tpu.memory_space<smem>>
    %244 = vector.broadcast %243 : f32 to vector<1x360xf32>
    %245 = arith.mulf %244, %234 : vector<1x360xf32>
    %246 = arith.addf %232, %245 : vector<1x360xf32>
    %c0_186 = arith.constant 0 : index
    %c1_187 = arith.constant 1 : index
    %c40_188 = arith.constant 40 : index
    %247 = vector.load %arg5[%c0_186, %c1_187, %c40_188] : memref<1x3x402xf32, #tpu.memory_space<vmem>>, vector<1x1x360xf32>
    %248 = vector.shape_cast %247 : vector<1x1x360xf32> to vector<1x360xf32>
    %c0_189 = arith.constant 0 : index
    %c15 = arith.constant 15 : index
    %249 = memref.load %arg2[%c0_189, %c15] : memref<3x27xf32, #tpu.memory_space<smem>>
    %250 = vector.broadcast %249 : f32 to vector<1x360xf32>
    %251 = arith.mulf %250, %248 : vector<1x360xf32>
    %252 = arith.addf %238, %251 : vector<1x360xf32>
    %c1_190 = arith.constant 1 : index
    %c15_191 = arith.constant 15 : index
    %253 = memref.load %arg2[%c1_190, %c15_191] : memref<3x27xf32, #tpu.memory_space<smem>>
    %254 = vector.broadcast %253 : f32 to vector<1x360xf32>
    %255 = arith.mulf %254, %248 : vector<1x360xf32>
    %256 = arith.addf %242, %255 : vector<1x360xf32>
    %c2_192 = arith.constant 2 : index
    %c15_193 = arith.constant 15 : index
    %257 = memref.load %arg2[%c2_192, %c15_193] : memref<3x27xf32, #tpu.memory_space<smem>>
    %258 = vector.broadcast %257 : f32 to vector<1x360xf32>
    %259 = arith.mulf %258, %248 : vector<1x360xf32>
    %260 = arith.addf %246, %259 : vector<1x360xf32>
    %c0_194 = arith.constant 0 : index
    %c1_195 = arith.constant 1 : index
    %c41_196 = arith.constant 41 : index
    %261 = vector.load %arg5[%c0_194, %c1_195, %c41_196] : memref<1x3x402xf32, #tpu.memory_space<vmem>>, vector<1x1x360xf32>
    %262 = vector.shape_cast %261 : vector<1x1x360xf32> to vector<1x360xf32>
    %c0_197 = arith.constant 0 : index
    %c16_198 = arith.constant 16 : index
    %263 = memref.load %arg2[%c0_197, %c16_198] : memref<3x27xf32, #tpu.memory_space<smem>>
    %264 = vector.broadcast %263 : f32 to vector<1x360xf32>
    %265 = arith.mulf %264, %262 : vector<1x360xf32>
    %266 = arith.addf %252, %265 : vector<1x360xf32>
    %c1_199 = arith.constant 1 : index
    %c16_200 = arith.constant 16 : index
    %267 = memref.load %arg2[%c1_199, %c16_200] : memref<3x27xf32, #tpu.memory_space<smem>>
    %268 = vector.broadcast %267 : f32 to vector<1x360xf32>
    %269 = arith.mulf %268, %262 : vector<1x360xf32>
    %270 = arith.addf %256, %269 : vector<1x360xf32>
    %c2_201 = arith.constant 2 : index
    %c16_202 = arith.constant 16 : index
    %271 = memref.load %arg2[%c2_201, %c16_202] : memref<3x27xf32, #tpu.memory_space<smem>>
    %272 = vector.broadcast %271 : f32 to vector<1x360xf32>
    %273 = arith.mulf %272, %262 : vector<1x360xf32>
    %274 = arith.addf %260, %273 : vector<1x360xf32>
    %c0_203 = arith.constant 0 : index
    %c1_204 = arith.constant 1 : index
    %c42_205 = arith.constant 42 : index
    %275 = vector.load %arg5[%c0_203, %c1_204, %c42_205] : memref<1x3x402xf32, #tpu.memory_space<vmem>>, vector<1x1x360xf32>
    %276 = vector.shape_cast %275 : vector<1x1x360xf32> to vector<1x360xf32>
    %c0_206 = arith.constant 0 : index
    %c17 = arith.constant 17 : index
    %277 = memref.load %arg2[%c0_206, %c17] : memref<3x27xf32, #tpu.memory_space<smem>>
    %278 = vector.broadcast %277 : f32 to vector<1x360xf32>
    %279 = arith.mulf %278, %276 : vector<1x360xf32>
    %280 = arith.addf %266, %279 : vector<1x360xf32>
    %c1_207 = arith.constant 1 : index
    %c17_208 = arith.constant 17 : index
    %281 = memref.load %arg2[%c1_207, %c17_208] : memref<3x27xf32, #tpu.memory_space<smem>>
    %282 = vector.broadcast %281 : f32 to vector<1x360xf32>
    %283 = arith.mulf %282, %276 : vector<1x360xf32>
    %284 = arith.addf %270, %283 : vector<1x360xf32>
    %c2_209 = arith.constant 2 : index
    %c17_210 = arith.constant 17 : index
    %285 = memref.load %arg2[%c2_209, %c17_210] : memref<3x27xf32, #tpu.memory_space<smem>>
    %286 = vector.broadcast %285 : f32 to vector<1x360xf32>
    %287 = arith.mulf %286, %276 : vector<1x360xf32>
    %288 = arith.addf %274, %287 : vector<1x360xf32>
    %c0_211 = arith.constant 0 : index
    %c2_212 = arith.constant 2 : index
    %c0_213 = arith.constant 0 : index
    %289 = vector.load %arg5[%c0_211, %c2_212, %c0_213] : memref<1x3x402xf32, #tpu.memory_space<vmem>>, vector<1x1x360xf32>
    %290 = vector.shape_cast %289 : vector<1x1x360xf32> to vector<1x360xf32>
    %c0_214 = arith.constant 0 : index
    %c18 = arith.constant 18 : index
    %291 = memref.load %arg2[%c0_214, %c18] : memref<3x27xf32, #tpu.memory_space<smem>>
    %292 = vector.broadcast %291 : f32 to vector<1x360xf32>
    %293 = arith.mulf %292, %290 : vector<1x360xf32>
    %294 = arith.addf %280, %293 : vector<1x360xf32>
    %c1_215 = arith.constant 1 : index
    %c18_216 = arith.constant 18 : index
    %295 = memref.load %arg2[%c1_215, %c18_216] : memref<3x27xf32, #tpu.memory_space<smem>>
    %296 = vector.broadcast %295 : f32 to vector<1x360xf32>
    %297 = arith.mulf %296, %290 : vector<1x360xf32>
    %298 = arith.addf %284, %297 : vector<1x360xf32>
    %c2_217 = arith.constant 2 : index
    %c18_218 = arith.constant 18 : index
    %299 = memref.load %arg2[%c2_217, %c18_218] : memref<3x27xf32, #tpu.memory_space<smem>>
    %300 = vector.broadcast %299 : f32 to vector<1x360xf32>
    %301 = arith.mulf %300, %290 : vector<1x360xf32>
    %302 = arith.addf %288, %301 : vector<1x360xf32>
    %c0_219 = arith.constant 0 : index
    %c2_220 = arith.constant 2 : index
    %c1_221 = arith.constant 1 : index
    %303 = vector.load %arg5[%c0_219, %c2_220, %c1_221] : memref<1x3x402xf32, #tpu.memory_space<vmem>>, vector<1x1x360xf32>
    %304 = vector.shape_cast %303 : vector<1x1x360xf32> to vector<1x360xf32>
    %c0_222 = arith.constant 0 : index
    %c19 = arith.constant 19 : index
    %305 = memref.load %arg2[%c0_222, %c19] : memref<3x27xf32, #tpu.memory_space<smem>>
    %306 = vector.broadcast %305 : f32 to vector<1x360xf32>
    %307 = arith.mulf %306, %304 : vector<1x360xf32>
    %308 = arith.addf %294, %307 : vector<1x360xf32>
    %c1_223 = arith.constant 1 : index
    %c19_224 = arith.constant 19 : index
    %309 = memref.load %arg2[%c1_223, %c19_224] : memref<3x27xf32, #tpu.memory_space<smem>>
    %310 = vector.broadcast %309 : f32 to vector<1x360xf32>
    %311 = arith.mulf %310, %304 : vector<1x360xf32>
    %312 = arith.addf %298, %311 : vector<1x360xf32>
    %c2_225 = arith.constant 2 : index
    %c19_226 = arith.constant 19 : index
    %313 = memref.load %arg2[%c2_225, %c19_226] : memref<3x27xf32, #tpu.memory_space<smem>>
    %314 = vector.broadcast %313 : f32 to vector<1x360xf32>
    %315 = arith.mulf %314, %304 : vector<1x360xf32>
    %316 = arith.addf %302, %315 : vector<1x360xf32>
    %c0_227 = arith.constant 0 : index
    %c2_228 = arith.constant 2 : index
    %c2_229 = arith.constant 2 : index
    %317 = vector.load %arg5[%c0_227, %c2_228, %c2_229] : memref<1x3x402xf32, #tpu.memory_space<vmem>>, vector<1x1x360xf32>
    %318 = vector.shape_cast %317 : vector<1x1x360xf32> to vector<1x360xf32>
    %c0_230 = arith.constant 0 : index
    %c20_231 = arith.constant 20 : index
    %319 = memref.load %arg2[%c0_230, %c20_231] : memref<3x27xf32, #tpu.memory_space<smem>>
    %320 = vector.broadcast %319 : f32 to vector<1x360xf32>
    %321 = arith.mulf %320, %318 : vector<1x360xf32>
    %322 = arith.addf %308, %321 : vector<1x360xf32>
    %c1_232 = arith.constant 1 : index
    %c20_233 = arith.constant 20 : index
    %323 = memref.load %arg2[%c1_232, %c20_233] : memref<3x27xf32, #tpu.memory_space<smem>>
    %324 = vector.broadcast %323 : f32 to vector<1x360xf32>
    %325 = arith.mulf %324, %318 : vector<1x360xf32>
    %326 = arith.addf %312, %325 : vector<1x360xf32>
    %c2_234 = arith.constant 2 : index
    %c20_235 = arith.constant 20 : index
    %327 = memref.load %arg2[%c2_234, %c20_235] : memref<3x27xf32, #tpu.memory_space<smem>>
    %328 = vector.broadcast %327 : f32 to vector<1x360xf32>
    %329 = arith.mulf %328, %318 : vector<1x360xf32>
    %330 = arith.addf %316, %329 : vector<1x360xf32>
    %c0_236 = arith.constant 0 : index
    %c2_237 = arith.constant 2 : index
    %c20_238 = arith.constant 20 : index
    %331 = vector.load %arg5[%c0_236, %c2_237, %c20_238] : memref<1x3x402xf32, #tpu.memory_space<vmem>>, vector<1x1x360xf32>
    %332 = vector.shape_cast %331 : vector<1x1x360xf32> to vector<1x360xf32>
    %c0_239 = arith.constant 0 : index
    %c21_240 = arith.constant 21 : index
    %333 = memref.load %arg2[%c0_239, %c21_240] : memref<3x27xf32, #tpu.memory_space<smem>>
    %334 = vector.broadcast %333 : f32 to vector<1x360xf32>
    %335 = arith.mulf %334, %332 : vector<1x360xf32>
    %336 = arith.addf %322, %335 : vector<1x360xf32>
    %c1_241 = arith.constant 1 : index
    %c21_242 = arith.constant 21 : index
    %337 = memref.load %arg2[%c1_241, %c21_242] : memref<3x27xf32, #tpu.memory_space<smem>>
    %338 = vector.broadcast %337 : f32 to vector<1x360xf32>
    %339 = arith.mulf %338, %332 : vector<1x360xf32>
    %340 = arith.addf %326, %339 : vector<1x360xf32>
    %c2_243 = arith.constant 2 : index
    %c21_244 = arith.constant 21 : index
    %341 = memref.load %arg2[%c2_243, %c21_244] : memref<3x27xf32, #tpu.memory_space<smem>>
    %342 = vector.broadcast %341 : f32 to vector<1x360xf32>
    %343 = arith.mulf %342, %332 : vector<1x360xf32>
    %344 = arith.addf %330, %343 : vector<1x360xf32>
    %c0_245 = arith.constant 0 : index
    %c2_246 = arith.constant 2 : index
    %c21_247 = arith.constant 21 : index
    %345 = vector.load %arg5[%c0_245, %c2_246, %c21_247] : memref<1x3x402xf32, #tpu.memory_space<vmem>>, vector<1x1x360xf32>
    %346 = vector.shape_cast %345 : vector<1x1x360xf32> to vector<1x360xf32>
    %c0_248 = arith.constant 0 : index
    %c22_249 = arith.constant 22 : index
    %347 = memref.load %arg2[%c0_248, %c22_249] : memref<3x27xf32, #tpu.memory_space<smem>>
    %348 = vector.broadcast %347 : f32 to vector<1x360xf32>
    %349 = arith.mulf %348, %346 : vector<1x360xf32>
    %350 = arith.addf %336, %349 : vector<1x360xf32>
    %c1_250 = arith.constant 1 : index
    %c22_251 = arith.constant 22 : index
    %351 = memref.load %arg2[%c1_250, %c22_251] : memref<3x27xf32, #tpu.memory_space<smem>>
    %352 = vector.broadcast %351 : f32 to vector<1x360xf32>
    %353 = arith.mulf %352, %346 : vector<1x360xf32>
    %354 = arith.addf %340, %353 : vector<1x360xf32>
    %c2_252 = arith.constant 2 : index
    %c22_253 = arith.constant 22 : index
    %355 = memref.load %arg2[%c2_252, %c22_253] : memref<3x27xf32, #tpu.memory_space<smem>>
    %356 = vector.broadcast %355 : f32 to vector<1x360xf32>
    %357 = arith.mulf %356, %346 : vector<1x360xf32>
    %358 = arith.addf %344, %357 : vector<1x360xf32>
    %c0_254 = arith.constant 0 : index
    %c2_255 = arith.constant 2 : index
    %c22_256 = arith.constant 22 : index
    %359 = vector.load %arg5[%c0_254, %c2_255, %c22_256] : memref<1x3x402xf32, #tpu.memory_space<vmem>>, vector<1x1x360xf32>
    %360 = vector.shape_cast %359 : vector<1x1x360xf32> to vector<1x360xf32>
    %c0_257 = arith.constant 0 : index
    %c23 = arith.constant 23 : index
    %361 = memref.load %arg2[%c0_257, %c23] : memref<3x27xf32, #tpu.memory_space<smem>>
    %362 = vector.broadcast %361 : f32 to vector<1x360xf32>
    %363 = arith.mulf %362, %360 : vector<1x360xf32>
    %364 = arith.addf %350, %363 : vector<1x360xf32>
    %c1_258 = arith.constant 1 : index
    %c23_259 = arith.constant 23 : index
    %365 = memref.load %arg2[%c1_258, %c23_259] : memref<3x27xf32, #tpu.memory_space<smem>>
    %366 = vector.broadcast %365 : f32 to vector<1x360xf32>
    %367 = arith.mulf %366, %360 : vector<1x360xf32>
    %368 = arith.addf %354, %367 : vector<1x360xf32>
    %c2_260 = arith.constant 2 : index
    %c23_261 = arith.constant 23 : index
    %369 = memref.load %arg2[%c2_260, %c23_261] : memref<3x27xf32, #tpu.memory_space<smem>>
    %370 = vector.broadcast %369 : f32 to vector<1x360xf32>
    %371 = arith.mulf %370, %360 : vector<1x360xf32>
    %372 = arith.addf %358, %371 : vector<1x360xf32>
    %c0_262 = arith.constant 0 : index
    %c2_263 = arith.constant 2 : index
    %c40_264 = arith.constant 40 : index
    %373 = vector.load %arg5[%c0_262, %c2_263, %c40_264] : memref<1x3x402xf32, #tpu.memory_space<vmem>>, vector<1x1x360xf32>
    %374 = vector.shape_cast %373 : vector<1x1x360xf32> to vector<1x360xf32>
    %c0_265 = arith.constant 0 : index
    %c24 = arith.constant 24 : index
    %375 = memref.load %arg2[%c0_265, %c24] : memref<3x27xf32, #tpu.memory_space<smem>>
    %376 = vector.broadcast %375 : f32 to vector<1x360xf32>
    %377 = arith.mulf %376, %374 : vector<1x360xf32>
    %378 = arith.addf %364, %377 : vector<1x360xf32>
    %c1_266 = arith.constant 1 : index
    %c24_267 = arith.constant 24 : index
    %379 = memref.load %arg2[%c1_266, %c24_267] : memref<3x27xf32, #tpu.memory_space<smem>>
    %380 = vector.broadcast %379 : f32 to vector<1x360xf32>
    %381 = arith.mulf %380, %374 : vector<1x360xf32>
    %382 = arith.addf %368, %381 : vector<1x360xf32>
    %c2_268 = arith.constant 2 : index
    %c24_269 = arith.constant 24 : index
    %383 = memref.load %arg2[%c2_268, %c24_269] : memref<3x27xf32, #tpu.memory_space<smem>>
    %384 = vector.broadcast %383 : f32 to vector<1x360xf32>
    %385 = arith.mulf %384, %374 : vector<1x360xf32>
    %386 = arith.addf %372, %385 : vector<1x360xf32>
    %c0_270 = arith.constant 0 : index
    %c2_271 = arith.constant 2 : index
    %c41_272 = arith.constant 41 : index
    %387 = vector.load %arg5[%c0_270, %c2_271, %c41_272] : memref<1x3x402xf32, #tpu.memory_space<vmem>>, vector<1x1x360xf32>
    %388 = vector.shape_cast %387 : vector<1x1x360xf32> to vector<1x360xf32>
    %c0_273 = arith.constant 0 : index
    %c25 = arith.constant 25 : index
    %389 = memref.load %arg2[%c0_273, %c25] : memref<3x27xf32, #tpu.memory_space<smem>>
    %390 = vector.broadcast %389 : f32 to vector<1x360xf32>
    %391 = arith.mulf %390, %388 : vector<1x360xf32>
    %392 = arith.addf %378, %391 : vector<1x360xf32>
    %c1_274 = arith.constant 1 : index
    %c25_275 = arith.constant 25 : index
    %393 = memref.load %arg2[%c1_274, %c25_275] : memref<3x27xf32, #tpu.memory_space<smem>>
    %394 = vector.broadcast %393 : f32 to vector<1x360xf32>
    %395 = arith.mulf %394, %388 : vector<1x360xf32>
    %396 = arith.addf %382, %395 : vector<1x360xf32>
    %c2_276 = arith.constant 2 : index
    %c25_277 = arith.constant 25 : index
    %397 = memref.load %arg2[%c2_276, %c25_277] : memref<3x27xf32, #tpu.memory_space<smem>>
    %398 = vector.broadcast %397 : f32 to vector<1x360xf32>
    %399 = arith.mulf %398, %388 : vector<1x360xf32>
    %400 = arith.addf %386, %399 : vector<1x360xf32>
    %c0_278 = arith.constant 0 : index
    %c2_279 = arith.constant 2 : index
    %c42_280 = arith.constant 42 : index
    %401 = vector.load %arg5[%c0_278, %c2_279, %c42_280] : memref<1x3x402xf32, #tpu.memory_space<vmem>>, vector<1x1x360xf32>
    %402 = vector.shape_cast %401 : vector<1x1x360xf32> to vector<1x360xf32>
    %c0_281 = arith.constant 0 : index
    %c26 = arith.constant 26 : index
    %403 = memref.load %arg2[%c0_281, %c26] : memref<3x27xf32, #tpu.memory_space<smem>>
    %404 = vector.broadcast %403 : f32 to vector<1x360xf32>
    %405 = arith.mulf %404, %402 : vector<1x360xf32>
    %406 = arith.addf %392, %405 : vector<1x360xf32>
    %c1_282 = arith.constant 1 : index
    %c26_283 = arith.constant 26 : index
    %407 = memref.load %arg2[%c1_282, %c26_283] : memref<3x27xf32, #tpu.memory_space<smem>>
    %408 = vector.broadcast %407 : f32 to vector<1x360xf32>
    %409 = arith.mulf %408, %402 : vector<1x360xf32>
    %410 = arith.addf %396, %409 : vector<1x360xf32>
    %c2_284 = arith.constant 2 : index
    %c26_285 = arith.constant 26 : index
    %411 = memref.load %arg2[%c2_284, %c26_285] : memref<3x27xf32, #tpu.memory_space<smem>>
    %412 = vector.broadcast %411 : f32 to vector<1x360xf32>
    %413 = arith.mulf %412, %402 : vector<1x360xf32>
    %414 = arith.addf %400, %413 : vector<1x360xf32>
    %c0_286 = arith.constant 0 : index
    %415 = memref.load %arg3[%c0_286] : memref<3xf32, #tpu.memory_space<smem>>
    %416 = vector.broadcast %415 : f32 to vector<1x360xf32>
    %417 = arith.addf %406, %416 : vector<1x360xf32>
    %c0_287 = arith.constant 0 : index
    %c0_288 = arith.constant 0 : index
    %c0_289 = arith.constant 0 : index
    %418 = vector.load %arg4[%c0_287, %c0_288, %c0_289] : memref<1x3x360xf32, #tpu.memory_space<vmem>>, vector<1x1x360xf32>
    %419 = vector.shape_cast %418 : vector<1x1x360xf32> to vector<1x360xf32>
    %420 = vector.shape_cast %417 : vector<1x360xf32> to vector<1x1x360xf32>
    tpu.vector_store %arg4[%c0_287, %c0_288, %c0_289], %420 {strides = array<i32>} : memref<1x3x360xf32, #tpu.memory_space<vmem>>, vector<1x1x360xf32>,
    %c1_290 = arith.constant 1 : index
    %421 = memref.load %arg3[%c1_290] : memref<3xf32, #tpu.memory_space<smem>>
    %422 = vector.broadcast %421 : f32 to vector<1x360xf32>
    %423 = arith.addf %410, %422 : vector<1x360xf32>
    %c0_291 = arith.constant 0 : index
    %c1_292 = arith.constant 1 : index
    %c0_293 = arith.constant 0 : index
    %424 = vector.load %arg4[%c0_291, %c1_292, %c0_293] : memref<1x3x360xf32, #tpu.memory_space<vmem>>, vector<1x1x360xf32>
    %425 = vector.shape_cast %424 : vector<1x1x360xf32> to vector<1x360xf32>
    %426 = vector.shape_cast %423 : vector<1x360xf32> to vector<1x1x360xf32>
    tpu.vector_store %arg4[%c0_291, %c1_292, %c0_293], %426 {strides = array<i32>} : memref<1x3x360xf32, #tpu.memory_space<vmem>>, vector<1x1x360xf32>,
    %c2_294 = arith.constant 2 : index
    %427 = memref.load %arg3[%c2_294] : memref<3xf32, #tpu.memory_space<smem>>
    %428 = vector.broadcast %427 : f32 to vector<1x360xf32>
    %429 = arith.addf %414, %428 : vector<1x360xf32>
    %c0_295 = arith.constant 0 : index
    %c2_296 = arith.constant 2 : index
    %c0_297 = arith.constant 0 : index
    %430 = vector.load %arg4[%c0_295, %c2_296, %c0_297] : memref<1x3x360xf32, #tpu.memory_space<vmem>>, vector<1x1x360xf32>
    %431 = vector.shape_cast %430 : vector<1x1x360xf32> to vector<1x360xf32>
    %432 = vector.shape_cast %429 : vector<1x360xf32> to vector<1x1x360xf32>
    tpu.vector_store %arg4[%c0_295, %c2_296, %c0_297], %432 {strides = array<i32>} : memref<1x3x360xf32, #tpu.memory_space<vmem>>, vector<1x1x360xf32>,
    return
  }
  func.func @transform_0(%arg0: i32) -> (i32, i32, i32) {
    %c0_i32 = arith.constant 0 : i32
    %c0_i32_0 = arith.constant 0 : i32
    %c0_i32_1 = arith.constant 0 : i32
    return %arg0, %c0_i32, %c0_i32_0 : i32, i32, i32
  }
  func.func @transform_1(%arg0: i32) -> (i32, i32) {
    %c0_i32 = arith.constant 0 : i32
    %c0_i32_0 = arith.constant 0 : i32
    %c0_i32_1 = arith.constant 0 : i32
    return %c0_i32, %c0_i32_0 : i32, i32
  }
  func.func @transform_2(%arg0: i32) -> i32 {
    %c0_i32 = arith.constant 0 : i32
    %c0_i32_0 = arith.constant 0 : i32
    return %c0_i32 : i32
  }
  func.func @transform_3(%arg0: i32) -> (i32, i32, i32) {
    %c0_i32 = arith.constant 0 : i32
    %c0_i32_0 = arith.constant 0 : i32
    %c0_i32_1 = arith.constant 0 : i32
    return %arg0, %c0_i32, %c0_i32_0 : i32, i32, i32
  }
}

</mosaic_0001>

<bundles_post_ra>
// kernel: tpu_custom_call.1
= control target key start
LH: loop header
LB: loop body
LE: loop exit
PB: predicated region body
PF: predicated region fallthrough
CT: control target
= control target key end

     0   :  { %8 = vsyncpa [#allocation4], 0  ;;  %s1804_s0 = inlined_call_operand.vmem [shape: f32[2,3,256], index: 0, kind: input, shape index: {}]   ;;  %s1805_s1 = inlined_call_operand.vmem [shape: f32[3,27], index: 1, kind: input, shape index: {}]   ;;  %s1806_s2 = inlined_call_operand.vmem [shape: f32[3], index: 2, kind: input, shape index: {}]   ;;  %s1807_s3 = inlined_call_operand.vmem [shape: f32[2,3,360], index: 3, kind: output, shape index: {}]  }
   0x1   :  { %9 = vsyncpa [#allocation6], 0  ;;  %s1437_s12 = smov 0  }
   0x2 LB: > { %s1443_s13 = sadd.s32 4294967295, %s1389_s12   ;;  %p1194_p0 = scmp.ge.s32.totalorder %s1389_s12, 1  ;;  %s1389_s12 = sphi %s1437_s12, %s15_s12  }
   0x3   : > { %p114_p1 = scmp.lt.s32.totalorder %s1389_s12, 3  ;;  %s127_s16 = sshll.u32 %s1805_s1, 4  ;;  %s128_s16 = int_to_ptr.vmem [resolvable:$true] %s127_s16 }
   0x4   : > { %p1808_p3 = scmp.eq.s32.totalorder %s1443_s13, 0  ;;  %s138_s20 = sshll.u32 %s1806_s2, 4  ;;  %s139_s20 = int_to_ptr.vmem [resolvable:$true] %s138_s20 }
   0x5   : > { %p1450_p2 = pnand %p1194_p0, %p114_p1  ;;  %s1345_s22 = scalar_lea.vmem %s128_s16, 64 }
   0x6   : > { %p1346_p6 = scmp.ne.s32.totalorder %s128_s16, %s1345_s22  ;;  %p1353_p10 = scmp.lt.s32.totalorder %s128_s16, %s128_s16 }
   0x7   : > { %s1810_s17 = scalar_select %p1450_p2, 1, 0 }
   0x8   : > { %p1300_p4 = pneg %p1450_p2  ;;  %p1354_p11 = scmp.lt.s32.totalorder %s1345_s22, %s1345_s22 }
   0xa   : > { %p1462_p5 = pnand %p1808_p3, %p1300_p4  ;;  %p1355_p12 = por %p1354_p11, %p1353_p10 }
   0xc   : > { %p1347_p7 = pneg %p1462_p5 }
   0xe   : > { %p1348_p8 = pnand %p1347_p7, %p1346_p6 }
  0x10   : > { %p1349_p9 = pneg %p1348_p8 }
  0x12   : > { %p1356_p13 = pnand %p1355_p12, %p1349_p9 }
  0x14   : > { %1359 = shalt.err (!%p1356_p13)
}
  0x15   : > { %s1391_s23 = smov [#allocation3]   ;;  %s1360_s24 = scalar_lea.vmem %s139_s20, 16 }
  0x16   : > { %1303 = dma.vmem_to_smem (!%p1462_p5), %s128_s16, 64, %s1391_s23, [#allocation4]  }
  0x17   : > { %p1361_p0 = scmp.ne.s32.totalorder %s139_s20, %s1360_s24  ;;  %p1368_p3 = scmp.lt.s32.totalorder %s139_s20, %s139_s20 }
  0x18   : > { %p1369_p2 = scmp.lt.s32.totalorder %s1360_s24, %s1360_s24 }
  0x19   : > { %p1363_p1 = pnand %p1361_p0, %p1347_p7 }
  0x1a   : > { %p1370_p6 = por %p1369_p2, %p1368_p3 }
  0x1b   : > { %p1364_p4 = pneg %p1363_p1 }
  0x1d   : > { %p1371_p8 = pnand %p1370_p6, %p1364_p4 }
  0x1f   : > { %1374 = shalt.err (!%p1371_p8)
}
  0x20   : > { %s1392_s25 = smov [#allocation5]   ;;  %p1812_p9 = scmp.ne.s32.totalorder %s1810_s17, 0 }
  0x21   : > { %1306 = dma.vmem_to_smem (!%p1462_p5), %s139_s20, 16, %s1392_s25, [#allocation6]  }
  0x22   : > { %159 = sbr.rel (%p1812_p9) target bundleno = 470 (0x1d6), region = 32  ;;  %p1813_p10 = scmp.eq.s32.totalorder (!%p1812_p9), %s1443_s13, 0 }
  0x27   : > { %1380 = dma.done.wait (%p1813_p10), [#allocation4], 64   ;;  %p1814_p11 = pmov %p1813_p10 }
  0x28   : > { %p1815_p7 = pmov %p1813_p10 }
  0x29   : > { %1382 = vsyncadd (%p1814_p11), [#allocation4], 4294967232 }
  0x2a   : > { %1384 = dma.done.wait (%p1815_p7), [#allocation6], 16   ;;  %p1816_p2 = pmov %p1815_p7 }
  0x2c   : > { %1386 = vsyncadd (%p1816_p2), [#allocation6], 4294967280 }
  0x2d   : > { %169 = sfence }
  0x2e   : > { %p188_p3 = scmp.lt.s32.totalorder %s1443_s13, 1  ;;  %vm199_vm0 = vcmask 1042432   ;;  %vm200_vm1 = vcmask 145412   ;;  %v1393_v0 = vmov 0.0   ;;  %s1394_s30 = smov 58   ;;  %vm208_vm3 = vcmask 469328  }
  0x2f   : > { %198 = vst [vmem:[#allocation2] sm:$0x77] %v1393_v0  ;;  %vm201_vm2 = vmor %vm200_vm1, %vm199_vm0  ;;  %s1395_s4 = smov 42   ;;  %s1396_s5 = smov 46   ;;  %vm215_vm4 = vcmask 633328   ;;  %vm222_vm5 = vcmask 797328  }
  0x30   : > { %s1820_s13 = smov (!%p188_p3, %s1443_s13), 1  ;;  %202 = vst.msk [vmem:[#allocation2 + $0x8] sm:$0x77] %vm201_vm2, %v1393_v0  ;;  %s1397_s6 = smov 50   ;;  %vm239_vm6 = vcmask 1043408   ;;  %vm240_vm7 = vcmask 79876  }
  0x31   : > { %s1290_s26 = sshll.u32 %s1820_s13, 3  ;;  %s1398_s7 = smov 54   ;;  %vm236_vm8 = vcmask 474112   ;;  %vm229_vm9 = vcmask 961328   ;;  %vm241_vm10 = vmor %vm240_vm7, %vm239_vm6  ;;  %vm248_vm11 = vcmask 239728   ;;  %vm255_vm12 = vcmask 403728  }
  0x32   : > { %s1490_s29 = scalar_lea.vmem %s1804_s0, %s1290_s26  ;;  %s1399_s8 = smov 62   ;;  %vm262_vm13 = vcmask 567728   ;;  %vm269_vm14 = vcmask 731728   ;;  %vm286_vm15 = vcmask 1043344   ;;  %vm287_vm0 = vcmask 14340  }
  0x33   : > { %v231_v1 = vld [vmem:[%s1490_s29] sm:$0x7]  ;;  %s1400_s9 = smov 66   ;;  %s1401_s10 = smov 70   ;;  %v278_v9 = vld [vmem:[%s1490_s29 + $0x4] sm:$0x7] }
  0x34   : > { %v203_v2 = vld [vmem:[%s1490_s29] sm:$0x7]  ;;  %233 = vrot.lane.b32.xlu1 %v231_v1, %s1394_s30  ;;  %v264_v10 = vld [vmem:[%s1490_s29 + $0x4] sm:$0x7]  ;;  %s1402_s11 = smov 82   ;;  %s1403_s14 = smov 74  }
  0x35   : > { %205 = vrot.lane.b32.xlu0 %v203_v2, %s1395_s4  ;;  %v210_v3 = vld [vmem:[%s1490_s29] sm:$0x7]  ;;  %v271_v11 = vld [vmem:[%s1490_s29 + $0x4] sm:$0x7]  ;;  %s1404_s15 = smov 78   ;;  %s1405_s16 = smov 86  }
  0x36   : > { %v217_v4 = vld [vmem:[%s1490_s29] sm:$0x7]  ;;  %v290_v12 = vld [vmem:[%s1490_s29 + $0x4] sm:$0x7]  ;;  %s1406_s17 = smov 90   ;;  %s1407_s18 = smov 94  }
  0x37   : > { %v224_v5 = vld [vmem:[%s1490_s29] sm:$0x7]  ;;  %v297_v13 = vld [vmem:[%s1490_s29 + $0x4] sm:$0x7]  ;;  %s1408_s19 = smov 98   ;;  %s1409_s20 = smov 102  }
  0x38   : > { %219 = vrot.lane.b32.xlu1 %v217_v4, %s1397_s6  ;;  %v243_v6 = vld [vmem:[%s1490_s29] sm:$0x7]  ;;  %v304_v14 = vld [vmem:[%s1490_s29 + $0x4] sm:$0x7]  ;;  %vm283_vm1 = vcmask 670720   ;;  %vm276_vm2 = vcmask 895728  }
  0x39   : > { %212 = vrot.lane.b32.xlu0 %v210_v3, %s1396_s5  ;;  %v250_v7 = vld [vmem:[%s1490_s29] sm:$0x7]  ;;  %v311_v15 = vld [vmem:[%s1490_s29 + $0x4] sm:$0x7]  ;;  %vm309_vm6 = vcmask 502128   ;;  %vm316_vm7 = vcmask 666128  }
  0x3a   : > { %v257_v8 = vld [vmem:[%s1490_s29] sm:$0x7]  ;;  %v318_v16 = vld [vmem:[%s1490_s29 + $0x4] sm:$0x7]  ;;  %s1207_s21 = sld [smem:[#allocation3 + $0x81]]  ;;  %s1410_s29 = smov 127  }
  0x3b   : > { %s1206_s22 = sld [smem:[#allocation3 + $0x1]]  ;;  %s1411_s5 = smov 126  }
  0x3c   : > { %245 = vrot.lane.b32.xlu1 %v243_v6, %s1399_s8  ;;  %s1209_s23 = sld [smem:[#allocation3 + $0x2]] }
  0x3d   : > { %226 = vrot.lane.b32.xlu0 %v224_v5, %s1398_s7  ;;  %s1208_s24 = sld [smem:[#allocation3 + $0x101]] }
  0x3e   : > { %s1211_s25 = sld [smem:[#allocation3 + $0x102]] }
  0x3f   : > { %s1210_s26 = sld [smem:[#allocation3 + $0x82]] }
  0x40   : > { %259 = vrot.lane.b32.xlu1 %v257_v8, %s1401_s10  ;;  %v350_v37 = vstv %s1207_s21  ;;  %s1213_s27 = sld [smem:[#allocation3 + $0x83]]  ;;  %s1412_s10 = smov 108  }
  0x41   : > { %252 = vrot.lane.b32.xlu0 %v250_v7, %s1400_s9  ;;  %v339_v38 = vstv %s1206_s22  ;;  %s1212_s28 = sld [smem:[#allocation3 + $0x3]]  ;;  %s1414_s21 = smov 106  }
  0x42   : > { %v370_v42 = vstv %s1209_s23  ;;  %s1215_s30 = sld [smem:[#allocation3 + $0x4]] }
  0x43   : > { %v360_v43 = vstv %s1208_s24  ;;  %s1214_s4 = sld [smem:[#allocation3 + $0x103]]  ;;  %s1415_s24 = smov 88  }
  0x44   : > { %266 = vrot.lane.b32.xlu1 %v264_v10, %s1403_s14  ;;  %v391_v46 = vstv %s1211_s25  ;;  %s1217_s6 = sld [smem:[#allocation3 + $0x104]] }
  0x45   : > { %280 = vrot.lane.b32.xlu0 %v278_v9, %s1402_s11  ;;  %v381_v47 = vstv %s1210_s26  ;;  %s1216_s7 = sld [smem:[#allocation3 + $0x84]] }
  0x46   : > { %v412_v50 = vstv %s1213_s27  ;;  %s1219_s8 = sld [smem:[#allocation3 + $0x85]] }
  0x47   : > { %v401_v51 = vstv %s1212_s28  ;;  %s1218_s9 = sld [smem:[#allocation3 + $0x5]] }
  0x48   : > { %292 = vrot.lane.b32.xlu1 %v290_v12, %s1405_s16  ;;  %v432_v54 = vstv %s1215_s30  ;;  %s1221_s11 = sld [smem:[#allocation3 + $0x6]]  ;;  %s1416_s30 = smov 87  }
  0x49   : > { %273 = vrot.lane.b32.xlu0 %v271_v11, %s1404_s15  ;;  %v422_v55 = vstv %s1214_s4  ;;  %s1220_s14 = sld [smem:[#allocation3 + $0x105]]  ;;  %s1413_s15 = smov 107  }
  0x4a   : > { %v453_v58 = vstv %s1217_s6  ;;  %s1227_s22 = sld [smem:[#allocation3 + $0x8]] }
  0x4b   : > { %v443_v59 = vstv %s1216_s7  ;;  %s1226_s23 = sld [smem:[#allocation3 + $0x107]] }
  0x4c   : > { %306 = vrot.lane.b32.xlu1 %v304_v14, %s1407_s18  ;;  %v474_v62 = vstv %s1219_s8  ;;  %s1222_s18 = sld [smem:[#allocation3 + $0x86]] }
  0x4d   : > { %299 = vrot.lane.b32.xlu0 %v297_v13, %s1406_s17  ;;  %s1223_s17 = sld [smem:[#allocation3 + $0x106]]  ;;  %v463_v63 = vstv %s1218_s9 }
  0x4e   : > { %v495_v3 = vstv %s1221_s11  ;;  %s1229_s25 = sld [smem:[#allocation3 + $0x108]] }
  0x4f   : > { %v484_v4 = vstv %s1220_s14  ;;  %s1228_s26 = sld [smem:[#allocation3 + $0x88]] }
  0x50   : > { %320 = vrot.lane.b32.xlu1 %v318_v16, %s1409_s20  ;;  %s1224_s20 = sld [smem:[#allocation3 + $0x7]] }
  0x51   : > { %313 = vrot.lane.b32.xlu0 %v311_v15, %s1408_s19  ;;  %s1225_s19 = sld [smem:[#allocation3 + $0x87]]  ;;  %v557_v15 = vstv %s1227_s22  ;;  %v547_v16 = vstv %s1226_s23 }
  0x52   : > { %v506_v8 = vstv %s1222_s18  ;;  %s1234_s27 = sld [smem:[#allocation3 + $0x8a]] }
  0x53   : > { %v516_v7 = vstv %s1223_s17  ;;  %s1233_s28 = sld [smem:[#allocation3 + $0xa]] }
  0x54   : > { %s1236_s4 = sld [smem:[#allocation3 + $0xb]] }
  0x55   : > { %s1235_s6 = sld [smem:[#allocation3 + $0x10a]] }
  0x56   : > { %v526_v12 = vstv %s1224_s20  ;;  %s1238_s7 = sld [smem:[#allocation3 + $0x10b]] }
  0x57   : > { %v537_v11 = vstv %s1225_s19  ;;  %s1237_s8 = sld [smem:[#allocation3 + $0x8b]] }
  0x58   : > { %s1240_s9 = sld [smem:[#allocation3 + $0x8c]] }
  0x59   : > { %s1239_s11 = sld [smem:[#allocation3 + $0xc]] }
  0x5a   : > { %s1242_s14 = sld [smem:[#allocation3 + $0xd]] }
  0x5b   : > { %s1241_s17 = sld [smem:[#allocation3 + $0x10c]] }
  0x5c   : > { %s1244_s18 = sld [smem:[#allocation3 + $0x10d]] }
  0x5d   : > { %s1243_s19 = sld [smem:[#allocation3 + $0x8d]] }
  0x5e   : > { %s1246_s20 = sld [smem:[#allocation3 + $0x8e]] }
  0x5f   : > { %s1245_s22 = sld [smem:[#allocation3 + $0xe]] }
  0x60   : > { %s1248_s23 = sld [smem:[#allocation3 + $0xf]] }
  0xa6   : > { %v234_v17 = vpop.permute.xlu1 %233 }
  0xa7   : > { %v206_v18 = vpop.permute.xlu0 %205  ;;  %v235_v21 = vrot.slane %v234_v17, 4 }
  0xa8   : > { %209 = vst.msk [vmem:[#allocation2] sm:$0x7] %vm208_vm3, %v206_v18  ;;  %vm288_vm3 = vmor %vm287_vm0, %vm286_vm15  ;;  %vm532_vm15 = vcmask 711680   ;;  %vm563_vm0 = vcmask 703488  }
  0xa9   : > { %v237_v24 = vsel %vm236_vm8, %v235_v21, %v234_v17  ;;  %vm323_vm8 = vcmask 830128  }
  0xaa   : > { %v220_v20 = vpop.permute.xlu1 %219 }
  0xab   : > { %v213_v19 = vpop.permute.xlu0 %212 }
  0xac   : > { %216 = vst.msk [vmem:[#allocation2] sm:$0x7] %vm215_vm4, %v213_v19  ;;  %vm295_vm4 = vcmask 174128   ;;  %v578_v19 = vstv %s1229_s25  ;;  %s1247_s25 = sld [smem:[#allocation3 + $0x10e]] }
  0xad   : > { %223 = vst.msk [vmem:[#allocation2] sm:$0x7] %vm222_vm5, %v220_v20  ;;  %vm302_vm5 = vcmask 338128   ;;  %v568_v20 = vstv %s1228_s26  ;;  %s1250_s26 = sld [smem:[#allocation3 + $0x10f]] }
  0xae   : > { %v246_v23 = vpop.permute.xlu1 %245 }
  0xaf   : > { %v227_v22 = vpop.permute.xlu0 %226 }
  0xb0   : > { %230 = vst.msk [vmem:[#allocation2] sm:$0x7] %vm229_vm9, %v227_v22  ;;  %vm345_vm9 = vcmask 1039360  }
  0xb1   : > { %242 = vst.msk [vmem:[#allocation2] sm:$0x77] %vm241_vm10, %v237_v24  ;;  %v612_v24 = vstv %s1234_s27  ;;  %s1249_s27 = sld [smem:[#allocation3 + $0x8f]]  ;;  %vm376_vm10 = vcmask 1031168  }
  0xb2   : > { %249 = vst.msk [vmem:[#allocation2 + $0x4] sm:$0x7] %vm248_vm11, %v246_v23  ;;  %v260_v26 = vpop.permute.xlu1 %259  ;;  %vm407_vm11 = vcmask 883712  }
  0xb3   : > { %v253_v25 = vpop.permute.xlu0 %252 }
  0xb4   : > { %256 = vst.msk [vmem:[#allocation2 + $0x4] sm:$0x7] %vm255_vm12, %v253_v25  ;;  %v602_v25 = vstv %s1233_s28  ;;  %s1252_s28 = sld [smem:[#allocation3 + $0x90]]  ;;  %vm438_vm12 = vcmask 875520  }
  0xb5   : > { %263 = vst.msk [vmem:[#allocation2 + $0x4] sm:$0x7] %vm262_vm13, %v260_v26  ;;  %vm469_vm13 = vcmask 867328  }
  0xb6   : > { %v267_v28 = vpop.permute.xlu1 %266 }
  0xb7   : > { %v281_v27 = vpop.permute.xlu0 %280  ;;  %270 = vst.msk [vmem:[#allocation2 + $0x4] sm:$0x7] %vm269_vm14, %v267_v28  ;;  %v632_v28 = vstv %s1236_s4  ;;  %s1251_s4 = sld [smem:[#allocation3 + $0x10]]  ;;  %vm501_vm14 = vcmask 719872  }
  0xb8   : > { %v282_v29 = vrot.slane %v281_v27, 4 }
  0xba   : > { %v293_v31 = vpop.permute.xlu1 %292  ;;  %v284_v32 = vsel %vm283_vm1, %v282_v29, %v281_v27  ;;  %v622_v29 = vstv %s1235_s6  ;;  %s1254_s6 = sld [smem:[#allocation3 + $0x11]] }
  0xbb   : > { %v274_v30 = vpop.permute.xlu0 %273 }
  0xbc   : > { %277 = vst.msk [vmem:[#allocation2 + $0x4] sm:$0x7] %vm276_vm2, %v274_v30 }
  0xbd   : > { %289 = vst.msk [vmem:[#allocation2 + $0x4] sm:$0x77] %vm288_vm3, %v284_v32  ;;  %v652_v32 = vstv %s1238_s7  ;;  %s1253_s7 = sld [smem:[#allocation3 + $0x110]] }
  0xbe   : > { %296 = vst.msk [vmem:[#allocation2 + $0x8] sm:$0x7] %vm295_vm4, %v293_v31  ;;  %v307_v34 = vpop.permute.xlu1 %306 }
  0xbf   : > { %v300_v33 = vpop.permute.xlu0 %299 }
  0xc0   : > { %303 = vst.msk [vmem:[#allocation2 + $0x8] sm:$0x7] %vm302_vm5, %v300_v33  ;;  %v642_v33 = vstv %s1237_s8  ;;  %s1256_s8 = sld [smem:[#allocation3 + $0x111]] }
  0xc1   : > { %310 = vst.msk [vmem:[#allocation2 + $0x8] sm:$0x7] %vm309_vm6, %v307_v34 }
  0xc2   : > { %v321_v36 = vpop.permute.xlu1 %320 }
  0xc3   : > { %v314_v35 = vpop.permute.xlu0 %313 }
  0xc4   : > { %317 = vst.msk [vmem:[#allocation2 + $0x8] sm:$0x7] %vm316_vm7, %v314_v35 }
  0xc5   : > { %324 = vst.msk [vmem:[#allocation2 + $0x8] sm:$0x7] %vm323_vm8, %v321_v36  ;;  %v672_v36 = vstv %s1240_s9  ;;  %s1255_s9 = sld [smem:[#allocation3 + $0x91]] }
  0xcc   : > { %v1509_v39 = vld [vmem:[#allocation2] ss:$4 sm:$0x7]  ;;  %v1548_v23 = vld [vmem:[#allocation2 + $0x1] ss:$4 sm:$0x7] }
  0xcd   : > { %v351_v40 = vmul.f32 %v350_v37, %v1509_v39  ;;  %v340_v41 = vmul.f32 %v339_v38, %v1509_v39  ;;  %v371_v44 = vmul.f32 %v370_v42, %v1509_v39  ;;  %v361_v45 = vmul.f32 %v360_v43, %v1509_v39  ;;  %v493_v2 = vld [vmem:[#allocation2] ss:$4 sm:$0xf] }
  0xce   : > { %v392_v48 = vmul.f32 %v391_v46, %v1509_v39  ;;  %v382_v49 = vmul.f32 %v381_v47, %v1509_v39  ;;  %v413_v52 = vmul.f32 %v412_v50, %v1509_v39  ;;  %v402_v53 = vmul.f32 %v401_v51, %v1509_v39 }
  0xcf   : > { %353 = vrot.lane.b32.xlu1 %v351_v40, %s1410_s29  ;;  %342 = vrot.lane.b32.xlu0 %v340_v41, %s1410_s29  ;;  %v433_v56 = vmul.f32 %v432_v54, %v1509_v39  ;;  %v423_v57 = vmul.f32 %v422_v55, %v1509_v39  ;;  %v454_v60 = vmul.f32 %v453_v58, %v1509_v39  ;;  %v662_v37 = vstv %s1239_s11  ;;  %s1261_s11 = sld [smem:[#allocation3 + $0x93]] }
  0xd0   : > { %v444_v61 = vmul.f32 %v443_v59, %v1509_v39  ;;  %v475_v0 = vmul.f32 %v474_v62, %v1509_v39  ;;  %v464_v1 = vmul.f32 %v463_v63, %v1509_v39  ;;  %v496_v5 = vmul.f32 %v495_v3, %v493_v2 }
  0xd1   : > { %v485_v6 = vmul.f32 %v484_v4, %v1509_v39  ;;  %v517_v9 = vmul.f32 %v516_v7, %v493_v2  ;;  %v507_v10 = vmul.f32 %v506_v8, %v493_v2  ;;  %v538_v13 = vmul.f32 %v537_v11, %v493_v2 }
  0xd2   : > { %v527_v14 = vmul.f32 %v526_v12, %v493_v2  ;;  %v558_v17 = vmul.f32 %v557_v15, %v493_v2  ;;  %v548_v18 = vmul.f32 %v547_v16, %v493_v2  ;;  %v579_v21 = vmul.f32 %v578_v19, %v493_v2 }
  0xd3   : > { %373 = vrot.lane.b32.xlu1 %v371_v44, %s1411_s5  ;;  %363 = vrot.lane.b32.xlu0 %v361_v45, %s1410_s29  ;;  %v569_v22 = vmul.f32 %v568_v20, %v493_v2  ;;  %v613_v26 = vmul.f32 %v612_v24, %v1548_v23  ;;  %v603_v27 = vmul.f32 %v602_v25, %v1548_v23  ;;  %v692_v41 = vstv %s1242_s14  ;;  %s1260_s14 = sld [smem:[#allocation3 + $0x13]] }
  0xd4   : > { %v633_v30 = vmul.f32 %v632_v28, %v1548_v23  ;;  %v623_v31 = vmul.f32 %v622_v29, %v1548_v23  ;;  %v653_v34 = vmul.f32 %v652_v32, %v1548_v23  ;;  %v643_v35 = vmul.f32 %v642_v33, %v1548_v23 }
  0xd5   : > { %v673_v38 = vmul.f32 %v672_v36, %v1548_v23  ;;  %v663_v40 = vmul.f32 %v662_v37, %v1548_v23  ;;  %v682_v42 = vstv %s1241_s17  ;;  %v693_v43 = vmul.f32 %v692_v41, %v1548_v23  ;;  %s1263_s17 = sld [smem:[#allocation3 + $0x14]] }
  0xd6   : > { %v683_v44 = vmul.f32 %v682_v42, %v1548_v23  ;;  %v712_v45 = vstv %s1244_s18  ;;  %v702_v46 = vstv %s1243_s19  ;;  %v722_v50 = vstv %s1245_s22  ;;  %s1262_s18 = sld [smem:[#allocation3 + $0x113]] }
  0xd7   : > { %394 = vrot.lane.b32.xlu1 %v392_v48, %s1411_s5  ;;  %384 = vrot.lane.b32.xlu0 %v382_v49, %s1411_s5  ;;  %v713_v47 = vmul.f32 %v712_v45, %v1548_v23  ;;  %v703_v48 = vmul.f32 %v702_v46, %v1548_v23  ;;  %v732_v49 = vstv %s1246_s20  ;;  %v753_v54 = vstv %s1248_s23  ;;  %s1265_s19 = sld [smem:[#allocation3 + $0x114]] }
  0xd8   : > { %v733_v51 = vmul.f32 %v732_v49, %v1548_v23  ;;  %v742_v55 = vstv %s1247_s25  ;;  %v773_v58 = vstv %s1250_s26  ;;  %v763_v59 = vstv %s1249_s27  ;;  %s1264_s20 = sld [smem:[#allocation3 + $0x94]] }
  0xd9   : > { %v793_v62 = vstv %s1252_s28  ;;  %v783_v63 = vstv %s1251_s4  ;;  %v813_v2 = vstv %s1254_s6  ;;  %v803_v3 = vstv %s1253_s7  ;;  %s1267_s22 = sld [smem:[#allocation3 + $0x95]] }
  0xda   : > { %v823_v7 = vstv %s1255_s9  ;;  %v867_v11 = vstv %s1261_s11  ;;  %v857_v12 = vstv %s1260_s14  ;;  %s1266_s23 = sld [smem:[#allocation3 + $0x15]] }
  0xdb   : > { %415 = vrot.lane.b32.xlu1 %v413_v52, %s1412_s10  ;;  %404 = vrot.lane.b32.xlu0 %v402_v53, %s1412_s10  ;;  %v723_v52 = vmul.f32 %v722_v50, %v1548_v23  ;;  %v751_v53 = vld [vmem:[#allocation2 + $0x1] ss:$4 sm:$0xf]  ;;  %v887_v15 = vstv %s1263_s17  ;;  %s1269_s25 = sld [smem:[#allocation3 + $0x16]] }
  0xdc   : > { %v814_v4 = vmul.f32 %v813_v2, %v751_v53  ;;  %v877_v16 = vstv %s1262_s18  ;;  %s1268_s26 = sld [smem:[#allocation3 + $0x115]] }
  0xdd   : > { %v907_v19 = vstv %s1265_s19  ;;  %s1271_s27 = sld [smem:[#allocation3 + $0x116]] }
  0xde   : > { %v897_v20 = vstv %s1264_s20  ;;  %s1270_s28 = sld [smem:[#allocation3 + $0x96]] }
  0xdf   : > { %435 = vrot.lane.b32.xlu1 %v433_v56, %s1413_s15  ;;  %425 = vrot.lane.b32.xlu0 %v423_v57, %s1412_s10  ;;  %v754_v56 = vmul.f32 %v753_v54, %v751_v53  ;;  %v743_v57 = vmul.f32 %v742_v55, %v1548_v23  ;;  %v927_v24 = vstv %s1267_s22  ;;  %s1605_s4 = sld [smem:[#allocation3 + $0x80]] }
  0xe0   : > { %v917_v25 = vstv %s1266_s23  ;;  %s1607_s6 = sld [smem:[#allocation3]] }
  0xe1   : > { %v947_v28 = vstv %s1269_s25  ;;  %s1613_s7 = sld [smem:[#allocation3 + $0x17]] }
  0xe2   : > { %v937_v29 = vstv %s1268_s26  ;;  %s1623_s9 = sld [smem:[#allocation3 + $0x117]] }
  0xe3   : > { %456 = vrot.lane.b32.xlu1 %v454_v60, %s1413_s15  ;;  %446 = vrot.lane.b32.xlu0 %v444_v61, %s1413_s15  ;;  %v774_v60 = vmul.f32 %v773_v58, %v751_v53  ;;  %v764_v61 = vmul.f32 %v763_v59, %v751_v53  ;;  %v967_v32 = vstv %s1271_s27  ;;  %s1631_s11 = sld [smem:[#allocation3 + $0x118]]  ;;  %v1650_v58 = vld [vmem:[#allocation2 + $0x2] ss:$4 sm:$0xf] }
  0xe4   : > { %v957_v33 = vstv %s1270_s28  ;;  %s1635_s14 = sld [smem:[#allocation3 + $0x98]]  ;;  %s1291_s28 = smul.u32 12, %s1820_s13 }
  0xe5   : > { %s1648_s17 = sld [smem:[#allocation3 + $0x19]] }
  0xe6   : > { %s1665_s18 = sld [smem:[#allocation3 + $0x119]] }
  0xe7   : > { %477 = vrot.lane.b32.xlu1 %v475_v0, %s1414_s21  ;;  %466 = vrot.lane.b32.xlu0 %v464_v1, %s1414_s21  ;;  %v794_v0 = vmul.f32 %v793_v62, %v751_v53  ;;  %v784_v1 = vmul.f32 %v783_v63, %v751_v53  ;;  %s1673_s19 = sld [smem:[#allocation3 + $0x11a]] }
  0xe8   : > { %s1724_s20 = sld [smem:[#allocation3 + $0x12]] }
  0xe9   : > { %s1733_s22 = sld [smem:[#allocation3 + $0x92]] }
  0xea   : > { %s1736_s23 = sld [smem:[#allocation3 + $0x112]] }
  0xeb   : > { %498 = vrot.lane.b32.xlu1 %v496_v5, %s1415_s24  ;;  %487 = vrot.lane.b32.xlu0 %v485_v6, %s1414_s21  ;;  %v804_v5 = vmul.f32 %v803_v3, %v751_v53  ;;  %v833_v6 = vstv %s1256_s8  ;;  %s1621_s8 = sld [smem:[#allocation3 + $0x18]] }
  0xec   : > { %v834_v8 = vmul.f32 %v833_v6, %v751_v53  ;;  %s1765_s25 = sld [smem:[#allocation5]] }
  0xed   : > { %s1770_s26 = sld [smem:[#allocation5 + $0x2]] }
  0xee   : > { %s1775_s27 = sld [smem:[#allocation5 + $0x1]] }
  0xef   : > { %519 = vrot.lane.b32.xlu1 %v517_v9, %s1415_s24  ;;  %509 = vrot.lane.b32.xlu0 %v507_v10, %s1415_s24  ;;  %v824_v9 = vmul.f32 %v823_v7, %v751_v53  ;;  %v1589_v10 = vld [vmem:[#allocation2 + $0x2] ss:$4 sm:$0x7]  ;;  %v1028_v7 = vstv %s1631_s11 }
  0xf1   : > { %v1008_v59 = vstv %s1621_s8 }
  0xf3   : > { %540 = vrot.lane.b32.xlu1 %v538_v13, %s1416_s30  ;;  %529 = vrot.lane.b32.xlu0 %v527_v14, %s1416_s30  ;;  %v868_v13 = vmul.f32 %v867_v11, %v1589_v10  ;;  %v858_v14 = vmul.f32 %v857_v12, %v1589_v10 }
  0xf7   : > { %560 = vrot.lane.b32.xlu1 %v558_v17, %s1405_s16  ;;  %550 = vrot.lane.b32.xlu0 %v548_v18, %s1416_s30  ;;  %v888_v17 = vmul.f32 %v887_v15, %v1589_v10  ;;  %v878_v18 = vmul.f32 %v877_v16, %v1589_v10  ;;  %v1029_v16 = vmul.f32 %v1028_v7, %v1650_v58 }
  0xfb   : > { %581 = vrot.lane.b32.xlu1 %v579_v21, %s1405_s16  ;;  %571 = vrot.lane.b32.xlu0 %v569_v22, %s1405_s16  ;;  %v908_v21 = vmul.f32 %v907_v19, %v1589_v10  ;;  %v898_v22 = vmul.f32 %v897_v20, %v1589_v10 }
  0xff   : > { %615 = vrot.lane.b32.xlu1 %v613_v26, %s1410_s29  ;;  %605 = vrot.lane.b32.xlu0 %v603_v27, %s1410_s29  ;;  %v928_v26 = vmul.f32 %v927_v24, %v1589_v10  ;;  %v918_v27 = vmul.f32 %v917_v25, %v1589_v10 }
 0x103   : > { %635 = vrot.lane.b32.xlu1 %v633_v30, %s1411_s5  ;;  %625 = vrot.lane.b32.xlu0 %v623_v31, %s1410_s29  ;;  %v948_v30 = vmul.f32 %v947_v28, %v1589_v10  ;;  %v938_v31 = vmul.f32 %v937_v29, %v1589_v10 }
 0x107   : > { %655 = vrot.lane.b32.xlu1 %v653_v34, %s1411_s5  ;;  %645 = vrot.lane.b32.xlu0 %v643_v35, %s1411_s5  ;;  %v331_v34 = vstv %s1605_s4  ;;  %v327_v35 = vstv %s1607_s6  ;;  %s197_s6 = scalar_lea.vmem %s1807_s3, %s1291_s28 }
 0x108   : > { %v332_v45 = vmul.f32 %v331_v34, %v1509_v39  ;;  %v328_v46 = vmul.f32 %v327_v35, %v1509_v39  ;;  %v1058_v34 = vstv %s1665_s18 }
 0x10b   : > { %675 = vrot.lane.b32.xlu1 %v673_v38, %s1412_s10  ;;  %665 = vrot.lane.b32.xlu0 %v663_v40, %s1412_s10  ;;  %v968_v38 = vmul.f32 %v967_v32, %v1589_v10  ;;  %v958_v40 = vmul.f32 %v957_v33, %v1589_v10 }
 0x10f   : > { %695 = vrot.lane.b32.xlu1 %v693_v43, %s1413_s15  ;;  %685 = vrot.lane.b32.xlu0 %v683_v44, %s1412_s10  ;;  %v977_v44 = vstv %s1613_s7 }
 0x110   : > { %v978_v55 = vmul.f32 %v977_v44, %v1589_v10 }
 0x113   : > { %715 = vrot.lane.b32.xlu1 %v713_v47, %s1413_s15  ;;  %705 = vrot.lane.b32.xlu0 %v703_v48, %s1413_s15 }
 0x117   : > { %735 = vrot.lane.b32.xlu1 %v733_v51, %s1414_s21  ;;  %725 = vrot.lane.b32.xlu0 %v723_v52, %s1414_s21 }
 0x11b   : > { %756 = vrot.lane.b32.xlu1 %v754_v56, %s1415_s24  ;;  %745 = vrot.lane.b32.xlu0 %v743_v57, %s1414_s21 }
 0x11f   : > { %776 = vrot.lane.b32.xlu1 %v774_v60, %s1415_s24  ;;  %766 = vrot.lane.b32.xlu0 %v764_v61, %s1415_s24  ;;  %v997_v60 = vstv %s1623_s9 }
 0x123   : > { %796 = vrot.lane.b32.xlu1 %v794_v0, %s1416_s30  ;;  %786 = vrot.lane.b32.xlu0 %v784_v1, %s1416_s30 }
 0x127   : > { %816 = vrot.lane.b32.xlu1 %v814_v4, %s1405_s16  ;;  %806 = vrot.lane.b32.xlu0 %v804_v5, %s1416_s30  ;;  %v1009_v4 = vmul.f32 %v1008_v59, %v1650_v58  ;;  %v998_v5 = vmul.f32 %v997_v60, %v1589_v10 }
 0x12b   : > { %836 = vrot.lane.b32.xlu1 %v834_v8, %s1405_s16  ;;  %826 = vrot.lane.b32.xlu0 %v824_v9, %s1405_s16  ;;  %v1018_v8 = vstv %s1635_s14 }
 0x12f   : > { %870 = vrot.lane.b32.xlu1 %v868_v13, %s1410_s29  ;;  %860 = vrot.lane.b32.xlu0 %v858_v14, %s1410_s29 }
 0x133   : > { %890 = vrot.lane.b32.xlu1 %v888_v17, %s1411_s5  ;;  %880 = vrot.lane.b32.xlu0 %v878_v18, %s1410_s29  ;;  %s1611_s29 = sld [smem:[#allocation3 + $0x97]]  ;;  %v1019_v17 = vmul.f32 %v1018_v8, %v1650_v58 }
 0x137   : > { %910 = vrot.lane.b32.xlu1 %v908_v21, %s1411_s5  ;;  %900 = vrot.lane.b32.xlu0 %v898_v22, %s1411_s5  ;;  %s1617_s5 = sld [smem:[#allocation3 + $0x100]]  ;;  %v1038_v21 = vstv %s1648_s17 }
 0x139   : > { %v987_v43 = vstv %s1611_s29 }
 0x13a   : > { %v988_v54 = vmul.f32 %v987_v43, %v1589_v10  ;;  %v1059_v43 = vmul.f32 %v1058_v34, %v1650_v58 }
 0x13b   : > { %930 = vrot.lane.b32.xlu1 %v928_v26, %s1412_s10  ;;  %920 = vrot.lane.b32.xlu0 %v918_v27, %s1412_s10 }
 0x13d   : > { %v335_v49 = vstv %s1617_s5 }
 0x13e   : > { %v336_v61 = vmul.f32 %v335_v49, %v1509_v39 }
 0x13f   : > { %950 = vrot.lane.b32.xlu1 %v948_v30, %s1413_s15  ;;  %940 = vrot.lane.b32.xlu0 %v938_v31, %s1412_s10  ;;  %s1644_s10 = sld [smem:[#allocation3 + $0x99]]  ;;  %v1039_v30 = vmul.f32 %v1038_v21, %v1650_v58 }
 0x141   : > { %v354_v36 = vpop.permute.xlu1 %353  ;;  %v343_v37 = vpop.permute.xlu0 %342 }
 0x142   : > { %v355_v41 = vrot.slane %v354_v36, 1  ;;  %v344_v42 = vrot.slane %v343_v37, 1 }
 0x143   : > { %970 = vrot.lane.b32.xlu1 %v968_v38, %s1413_s15  ;;  %960 = vrot.lane.b32.xlu0 %v958_v40, %s1413_s15  ;;  %s1661_s15 = sld [smem:[#allocation3 + $0x1a]] }
 0x144   : > { %v356_v47 = vsel %vm345_vm9, %v354_v36, %v355_v41  ;;  %v346_v48 = vsel %vm345_vm9, %v343_v37, %v344_v42 }
 0x145   : > { %v358_v50 = vadd.f32 %v356_v47, %v332_v45  ;;  %v348_v51 = vadd.f32 %v346_v48, %v328_v46  ;;  %v374_v52 = vpop.permute.xlu1 %373  ;;  %v364_v53 = vpop.permute.xlu0 %363  ;;  %v1048_v20 = vstv %s1644_s10  ;;  %v1088_v46 = vstv %s1673_s19 }
 0x146   : > { %v375_v56 = vrot.slane %v374_v52, 1  ;;  %v365_v57 = vrot.slane %v364_v53, 1  ;;  %v1049_v29 = vmul.f32 %v1048_v20, %v1650_v58 }
 0x147   : > { %990 = vrot.lane.b32.xlu1 %v988_v54, %s1414_s21  ;;  %980 = vrot.lane.b32.xlu0 %v978_v55, %s1414_s21  ;;  %v1089_v54 = vmul.f32 %v1088_v46, %v1650_v58 }
 0x148   : > { %v377_v62 = vsel %vm376_vm10, %v374_v52, %v375_v56  ;;  %v366_v63 = vsel %vm345_vm9, %v364_v53, %v365_v57 }
 0x149   : > { %v379_v0 = vadd.f32 %v377_v62, %v348_v51  ;;  %v368_v1 = vadd.f32 %v366_v63, %v336_v61  ;;  %v395_v2 = vpop.permute.xlu1 %394  ;;  %v385_v3 = vpop.permute.xlu0 %384  ;;  %v1068_v33 = vstv %s1661_s15 }
 0x14a   : > { %v396_v6 = vrot.slane %v395_v2, 1  ;;  %v386_v39 = vrot.slane %v385_v3, 1  ;;  %v1069_v42 = vmul.f32 %v1068_v33, %v1650_v58 }
 0x14b   : > { %1011 = vrot.lane.b32.xlu1 %v1009_v4, %s1415_s24  ;;  %1000 = vrot.lane.b32.xlu0 %v998_v5, %s1414_s21  ;;  %s1677_s21 = sld [smem:[#allocation3 + $0x9a]] }
 0x14c   : > { %v397_v9 = vsel %vm376_vm10, %v395_v2, %v396_v6  ;;  %v387_v11 = vsel %vm376_vm10, %v385_v3, %v386_v39 }
 0x14d   : > { %v399_v12 = vadd.f32 %v397_v9, %v368_v1  ;;  %v389_v13 = vadd.f32 %v387_v11, %v358_v50  ;;  %v416_v14 = vpop.permute.xlu1 %415  ;;  %v405_v15 = vpop.permute.xlu0 %404 }
 0x14e   : > { %v417_v18 = vrot.slane %v416_v14, 1  ;;  %v406_v19 = vrot.slane %v405_v15, 1 }
 0x14f   : > { %1031 = vrot.lane.b32.xlu1 %v1029_v16, %s1415_s24  ;;  %1021 = vrot.lane.b32.xlu0 %v1019_v17, %s1415_s24  ;;  %s1231_s24 = sld [smem:[#allocation3 + $0x89]] }
 0x150   : > { %v418_v22 = vsel %vm407_vm11, %v416_v14, %v417_v18  ;;  %v408_v24 = vsel %vm407_vm11, %v405_v15, %v406_v19 }
 0x151   : > { %v420_v25 = vadd.f32 %v418_v22, %v389_v13  ;;  %v410_v26 = vadd.f32 %v408_v24, %v379_v0  ;;  %v436_v27 = vpop.permute.xlu1 %435  ;;  %v426_v28 = vpop.permute.xlu0 %425  ;;  %v1078_v47 = vstv %s1677_s21 }
 0x152   : > { %v437_v31 = vrot.slane %v436_v27, 1  ;;  %v427_v32 = vrot.slane %v426_v28, 1  ;;  %v1079_v55 = vmul.f32 %v1078_v47, %v1650_v58 }
 0x153   : > { %1051 = vrot.lane.b32.xlu1 %v1049_v29, %s1416_s30  ;;  %1041 = vrot.lane.b32.xlu0 %v1039_v30, %s1416_s30 }
 0x154   : > { %v439_v35 = vsel %vm438_vm12, %v436_v27, %v437_v31  ;;  %v428_v36 = vsel %vm407_vm11, %v426_v28, %v427_v32 }
 0x155   : > { %v441_v37 = vadd.f32 %v439_v35, %v410_v26  ;;  %v430_v38 = vadd.f32 %v428_v36, %v399_v12  ;;  %v457_v40 = vpop.permute.xlu1 %456  ;;  %v447_v41 = vpop.permute.xlu0 %446 }
 0x156   : > { %v458_v44 = vrot.slane %v457_v40, 1  ;;  %v448_v45 = vrot.slane %v447_v41, 1 }
 0x157   : > { %1071 = vrot.lane.b32.xlu1 %v1069_v42, %s1405_s16  ;;  %1061 = vrot.lane.b32.xlu0 %v1059_v43, %s1416_s30  ;;  %s1232_s30 = sld [smem:[#allocation3 + $0x109]] }
 0x158   : > { %v459_v48 = vsel %vm438_vm12, %v457_v40, %v458_v44  ;;  %v449_v49 = vsel %vm438_vm12, %v447_v41, %v448_v45 }
 0x159   : > { %v461_v50 = vadd.f32 %v459_v48, %v430_v38  ;;  %v451_v51 = vadd.f32 %v449_v49, %v420_v25  ;;  %v478_v52 = vpop.permute.xlu1 %477  ;;  %v467_v53 = vpop.permute.xlu0 %466 }
 0x15a   : > { %v479_v56 = vrot.slane %v478_v52, 1  ;;  %v468_v57 = vrot.slane %v467_v53, 1 }
 0x15b   : > { %1091 = vrot.lane.b32.xlu1 %v1089_v54, %s1405_s16  ;;  %1081 = vrot.lane.b32.xlu0 %v1079_v55, %s1405_s16  ;;  %s1230_s16 = sld [smem:[#allocation3 + $0x9]] }
 0x15c   : > { %v480_v59 = vsel %vm469_vm13, %v478_v52, %v479_v56  ;;  %v470_v60 = vsel %vm469_vm13, %v467_v53, %v468_v57 }
 0x15d   : > { %v482_v61 = vadd.f32 %v480_v59, %v451_v51  ;;  %v472_v62 = vadd.f32 %v470_v60, %v441_v37  ;;  %v499_v63 = vpop.permute.xlu1 %498  ;;  %v488_v0 = vpop.permute.xlu0 %487  ;;  %v594_v37 = vstv %s1231_s24  ;;  %v598_v38 = vstv %s1232_s30 }
 0x15e   : > { %v500_v1 = vrot.slane %v499_v63, 1  ;;  %v489_v2 = vrot.slane %v488_v0, 1  ;;  %v595_v45 = vmul.f32 %v594_v37, %v1548_v23  ;;  %v599_v48 = vmul.f32 %v598_v38, %v1548_v23 }
 0x160   : > { %v502_v3 = vsel %vm501_vm14, %v499_v63, %v500_v1  ;;  %v490_v58 = vsel %vm469_vm13, %v488_v0, %v489_v2 }
 0x161   : > { %v504_v4 = vadd.f32 %v502_v3, %v472_v62  ;;  %v492_v5 = vadd.f32 %v490_v58, %v461_v50  ;;  %v520_v6 = vpop.permute.xlu1 %519  ;;  %v510_v39 = vpop.permute.xlu0 %509  ;;  %v590_v27 = vstv %s1230_s16 }
 0x162   : > { %v521_v7 = vrot.slane %v520_v6, 1  ;;  %v511_v8 = vrot.slane %v510_v39, 1  ;;  %v591_v34 = vmul.f32 %v590_v27, %v1548_v23 }
 0x164   : > { %v522_v9 = vsel %vm501_vm14, %v520_v6, %v521_v7  ;;  %v512_v11 = vsel %vm501_vm14, %v510_v39, %v511_v8 }
 0x165   : > { %v524_v12 = vadd.f32 %v522_v9, %v492_v5  ;;  %v514_v13 = vadd.f32 %v512_v11, %v482_v61  ;;  %v541_v14 = vpop.permute.xlu1 %540  ;;  %v530_v15 = vpop.permute.xlu0 %529 }
 0x166   : > { %v542_v16 = vrot.slane %v541_v14, 1  ;;  %v531_v17 = vrot.slane %v530_v15, 1 }
 0x168   : > { %v543_v18 = vsel %vm532_vm15, %v541_v14, %v542_v16  ;;  %v533_v19 = vsel %vm532_vm15, %v530_v15, %v531_v17 }
 0x169   : > { %v545_v20 = vadd.f32 %v543_v18, %v514_v13  ;;  %v535_v21 = vadd.f32 %v533_v19, %v504_v4  ;;  %v561_v22 = vpop.permute.xlu1 %560  ;;  %v551_v24 = vpop.permute.xlu0 %550 }
 0x16a   : > { %v562_v25 = vrot.slane %v561_v22, 1  ;;  %v552_v26 = vrot.slane %v551_v24, 1 }
 0x16c   : > { %v564_v28 = vsel %vm563_vm0, %v561_v22, %v562_v25  ;;  %v553_v29 = vsel %vm532_vm15, %v551_v24, %v552_v26 }
 0x16d   : > { %v566_v30 = vadd.f32 %v564_v28, %v535_v21  ;;  %v555_v31 = vadd.f32 %v553_v29, %v524_v12  ;;  %v582_v32 = vpop.permute.xlu1 %581  ;;  %v572_v33 = vpop.permute.xlu0 %571 }
 0x16e   : > { %v583_v35 = vrot.slane %v582_v32, 1  ;;  %v573_v36 = vrot.slane %v572_v33, 1 }
 0x16f   : > { %v592_v40 = vadd.f32 %v591_v34, %v566_v30 }
 0x170   : > { %v584_v41 = vsel %vm563_vm0, %v582_v32, %v583_v35  ;;  %v574_v42 = vsel %vm563_vm0, %v572_v33, %v573_v36 }
 0x171   : > { %v586_v43 = vadd.f32 %v584_v41, %v555_v31  ;;  %v576_v44 = vadd.f32 %v574_v42, %v545_v20  ;;  %v616_v46 = vpop.permute.xlu1 %615  ;;  %v606_v47 = vpop.permute.xlu0 %605 }
 0x172   : > { %v607_v62 = vrot.slane %v606_v47, 1  ;;  %v617_v3 = vrot.slane %v616_v46, 1 }
 0x173   : > { %v596_v49 = vadd.f32 %v595_v45, %v576_v44  ;;  %v600_v50 = vadd.f32 %v599_v48, %v586_v43 }
 0x174   : > { %v608_v23 = vsel %vm345_vm9, %v606_v47, %v607_v62  ;;  %v618_v11 = vsel %vm345_vm9, %v616_v46, %v617_v3 }
 0x175   : > { %v636_v51 = vpop.permute.xlu1 %635  ;;  %v626_v52 = vpop.permute.xlu0 %625  ;;  %v610_v12 = vadd.f32 %v608_v23, %v592_v40  ;;  %v620_v28 = vadd.f32 %v618_v11, %v596_v49 }
 0x176   : > { %v637_v1 = vrot.slane %v636_v51, 1  ;;  %v627_v2 = vrot.slane %v626_v52, 1 }
 0x178   : > { %v638_v39 = vsel %vm376_vm10, %v636_v51, %v637_v1  ;;  %v628_v7 = vsel %vm345_vm9, %v626_v52, %v627_v2 }
 0x179   : > { %v656_v53 = vpop.permute.xlu1 %655  ;;  %v646_v54 = vpop.permute.xlu0 %645  ;;  %v640_v18 = vadd.f32 %v638_v39, %v610_v12  ;;  %v630_v19 = vadd.f32 %v628_v7, %v600_v50 }
 0x17a   : > { %v657_v58 = vrot.slane %v656_v53, 1  ;;  %v647_v8 = vrot.slane %v646_v54, 1 }
 0x17c   : > { %v658_v14 = vsel %vm376_vm10, %v656_v53, %v657_v58  ;;  %v648_v25 = vsel %vm376_vm10, %v646_v54, %v647_v8 }
 0x17d   : > { %v676_v55 = vpop.permute.xlu1 %675  ;;  %v666_v56 = vpop.permute.xlu0 %665  ;;  %v660_v29 = vadd.f32 %v658_v14, %v630_v19  ;;  %v650_v36 = vadd.f32 %v648_v25, %v620_v28  ;;  %v853_v14 = vstv %s1736_s23 }
 0x17e   : > { %v667_v4 = vrot.slane %v666_v56, 1  ;;  %v677_v13 = vrot.slane %v676_v55, 1 }
 0x180   : > { %v668_v15 = vsel %vm407_vm11, %v666_v56, %v667_v4  ;;  %v678_v30 = vsel %vm407_vm11, %v676_v55, %v677_v13  ;;  %v849_v13 = vstv %s1733_s22 }
 0x181   : > { %v696_v57 = vpop.permute.xlu1 %695  ;;  %v686_v59 = vpop.permute.xlu0 %685  ;;  %v670_v31 = vadd.f32 %v668_v15, %v640_v18  ;;  %v680_v47 = vadd.f32 %v678_v30, %v650_v36 }
 0x182   : > { %v697_v9 = vrot.slane %v696_v57, 1  ;;  %v687_v16 = vrot.slane %v686_v59, 1 }
 0x184   : > { %v698_v26 = vsel %vm438_vm12, %v696_v57, %v697_v9  ;;  %v688_v32 = vsel %vm407_vm11, %v686_v59, %v687_v16 }
 0x185   : > { %v716_v60 = vpop.permute.xlu1 %715  ;;  %v706_v61 = vpop.permute.xlu0 %705  ;;  %v700_v37 = vadd.f32 %v698_v26, %v670_v31  ;;  %v690_v48 = vadd.f32 %v688_v32, %v660_v29  ;;  %v854_v26 = vmul.f32 %v853_v14, %v1589_v10 }
 0x186   : > { %v717_v20 = vrot.slane %v716_v60, 1  ;;  %v707_v21 = vrot.slane %v706_v61, 1 }
 0x188   : > { %v718_v38 = vsel %vm438_vm12, %v716_v60, %v717_v20  ;;  %v708_v40 = vsel %vm438_vm12, %v706_v61, %v707_v21  ;;  %v845_v60 = vstv %s1724_s20 }
 0x189   : > { %v736_v63 = vpop.permute.xlu1 %735  ;;  %v726_v0 = vpop.permute.xlu0 %725  ;;  %v720_v54 = vadd.f32 %v718_v38, %v690_v48  ;;  %v710_v55 = vadd.f32 %v708_v40, %v680_v47  ;;  %v846_v9 = vmul.f32 %v845_v60, %v1589_v10 }
 0x18a   : > { %v727_v17 = vrot.slane %v726_v0, 1  ;;  %v737_v33 = vrot.slane %v736_v63, 1 }
 0x18c   : > { %v728_v34 = vsel %vm469_vm13, %v726_v0, %v727_v17  ;;  %v738_v50 = vsel %vm469_vm13, %v736_v63, %v737_v33 }
 0x18d   : > { %v757_v5 = vpop.permute.xlu1 %756  ;;  %v746_v6 = vpop.permute.xlu0 %745  ;;  %v730_v49 = vadd.f32 %v728_v34, %v700_v37  ;;  %v740_v63 = vadd.f32 %v738_v50, %v710_v55 }
 0x18e   : > { %v758_v27 = vrot.slane %v757_v5, 1  ;;  %v747_v35 = vrot.slane %v746_v6, 1 }
 0x190   : > { %v759_v43 = vsel %vm501_vm14, %v757_v5, %v758_v27  ;;  %v748_v51 = vsel %vm469_vm13, %v746_v6, %v747_v35 }
 0x191   : > { %v777_v22 = vpop.permute.xlu1 %776  ;;  %v767_v24 = vpop.permute.xlu0 %766  ;;  %v761_v56 = vadd.f32 %v759_v43, %v730_v49  ;;  %v750_v2 = vadd.f32 %v748_v51, %v720_v54 }
 0x192   : > { %v778_v44 = vrot.slane %v777_v22, 1  ;;  %v768_v45 = vrot.slane %v767_v24, 1 }
 0x194   : > { %v779_v61 = vsel %vm501_vm14, %v777_v22, %v778_v44  ;;  %v769_v62 = vsel %vm501_vm14, %v767_v24, %v768_v45  ;;  %v850_v22 = vmul.f32 %v849_v13, %v1589_v10 }
 0x195   : > { %v797_v41 = vpop.permute.xlu1 %796  ;;  %v787_v42 = vpop.permute.xlu0 %786  ;;  %v781_v5 = vadd.f32 %v779_v61, %v750_v2  ;;  %v771_v6 = vadd.f32 %v769_v62, %v740_v63 }
 0x196   : > { %v788_v46 = vrot.slane %v787_v42, 1  ;;  %v798_v52 = vrot.slane %v797_v41, 1 }
 0x198   : > { %v789_v53 = vsel %vm532_vm15, %v787_v42, %v788_v46  ;;  %v799_v23 = vsel %vm532_vm15, %v797_v41, %v798_v52 }
 0x199   : > { %v817_v57 = vpop.permute.xlu1 %816  ;;  %v807_v59 = vpop.permute.xlu0 %806  ;;  %v791_v3 = vadd.f32 %v789_v53, %v761_v56  ;;  %v801_v15 = vadd.f32 %v799_v23, %v771_v6 }
 0x19a   : > { %v818_v0 = vrot.slane %v817_v57, 1  ;;  %v808_v1 = vrot.slane %v807_v59, 1 }
 0x19c   : > { %v819_v58 = vsel %vm563_vm0, %v817_v57, %v818_v0  ;;  %v809_v4 = vsel %vm532_vm15, %v807_v59, %v808_v1 }
 0x19d   : > { %v821_v39 = vadd.f32 %v819_v58, %v791_v3  ;;  %v837_v7 = vpop.permute.xlu1 %836  ;;  %v827_v8 = vpop.permute.xlu0 %826  ;;  %v811_v16 = vadd.f32 %v809_v4, %v781_v5 }
 0x19e   : > { %v838_v11 = vrot.slane %v837_v7, 1  ;;  %v828_v12 = vrot.slane %v827_v8, 1 }
 0x19f   : > { %v847_v17 = vadd.f32 %v846_v9, %v821_v39 }
 0x1a0   : > { %v839_v18 = vsel %vm563_vm0, %v837_v7, %v838_v11  ;;  %v829_v19 = vsel %vm563_vm0, %v827_v8, %v828_v12 }
 0x1a1   : > { %v841_v20 = vadd.f32 %v839_v18, %v811_v16  ;;  %v831_v21 = vadd.f32 %v829_v19, %v801_v15  ;;  %v871_v24 = vpop.permute.xlu1 %870  ;;  %v861_v25 = vpop.permute.xlu0 %860 }
 0x1a2   : > { %v862_v40 = vrot.slane %v861_v25, 1  ;;  %v872_v45 = vrot.slane %v871_v24, 1 }
 0x1a3   : > { %v851_v27 = vadd.f32 %v850_v22, %v831_v21  ;;  %v855_v28 = vadd.f32 %v854_v26, %v841_v20 }
 0x1a4   : > { %v863_v10 = vsel %vm345_vm9, %v861_v25, %v862_v40  ;;  %v873_v54 = vsel %vm345_vm9, %v871_v24, %v872_v45 }
 0x1a5   : > { %v891_v29 = vpop.permute.xlu1 %890  ;;  %v881_v30 = vpop.permute.xlu0 %880  ;;  %v865_v55 = vadd.f32 %v863_v10, %v847_v17  ;;  %v875_v5 = vadd.f32 %v873_v54, %v851_v27  ;;  %v1098_v10 = vstv %s1765_s25 }
 0x1a6   : > { %v892_v43 = vrot.slane %v891_v29, 1  ;;  %v882_v44 = vrot.slane %v881_v30, 1 }
 0x1a8   : > { %v893_v50 = vsel %vm376_vm10, %v891_v29, %v892_v43  ;;  %v883_v51 = vsel %vm345_vm9, %v881_v30, %v882_v44 }
 0x1a9   : > { %v911_v31 = vpop.permute.xlu1 %910  ;;  %v901_v32 = vpop.permute.xlu0 %900  ;;  %v895_v62 = vadd.f32 %v893_v50, %v865_v55  ;;  %v885_v0 = vadd.f32 %v883_v51, %v855_v28 }
 0x1aa   : > { %v912_v46 = vrot.slane %v911_v31, 1  ;;  %v902_v52 = vrot.slane %v901_v32, 1 }
 0x1ac   : > { %v913_v57 = vsel %vm376_vm10, %v911_v31, %v912_v46  ;;  %v903_v23 = vsel %vm376_vm10, %v901_v32, %v902_v52 }
 0x1ad   : > { %v931_v33 = vpop.permute.xlu1 %930  ;;  %v921_v34 = vpop.permute.xlu0 %920  ;;  %v915_v6 = vadd.f32 %v913_v57, %v885_v0  ;;  %v905_v13 = vadd.f32 %v903_v23, %v875_v5 }
 0x1ae   : > { %v922_v47 = vrot.slane %v921_v34, 1  ;;  %v932_v56 = vrot.slane %v931_v33, 1 }
 0x1b0   : > { %v923_v59 = vsel %vm407_vm11, %v921_v34, %v922_v47  ;;  %v933_v39 = vsel %vm407_vm11, %v931_v33, %v932_v56  ;;  %v1100_v34 = vlaneseq }
 0x1b1   : > { %v951_v35 = vpop.permute.xlu1 %950  ;;  %v941_v36 = vpop.permute.xlu0 %940  ;;  %v925_v7 = vadd.f32 %v923_v59, %v895_v62  ;;  %v935_v24 = vadd.f32 %v933_v39, %v905_v13  ;;  %v1106_v62 = vstv %s1775_s27 }
 0x1b2   : > { %v952_v53 = vrot.slane %v951_v35, 1  ;;  %v942_v60 = vrot.slane %v941_v36, 1  ;;  %vm1787_vm1 = vcmp.lt.s32.totalorder %v1100_v34, 360 }
 0x1b4   : > { %v953_v58 = vsel %vm438_vm12, %v951_v35, %v952_v53  ;;  %v943_v8 = vsel %vm407_vm11, %v941_v36, %v942_v60  ;;  %v1111_v60 = vstv %s1770_s26 }
 0x1b5   : > { %v971_v37 = vpop.permute.xlu1 %970  ;;  %v961_v38 = vpop.permute.xlu0 %960  ;;  %v955_v14 = vadd.f32 %v953_v58, %v925_v7  ;;  %v945_v25 = vadd.f32 %v943_v8, %v915_v6 }
 0x1b6   : > { %v972_v1 = vrot.slane %v971_v37, 1  ;;  %v962_v63 = vrot.slane %v961_v38, 1 }
 0x1b8   : > { %v973_v15 = vsel %vm438_vm12, %v971_v37, %v972_v1  ;;  %v963_v16 = vsel %vm438_vm12, %v961_v38, %v962_v63 }
 0x1b9   : > { %v991_v41 = vpop.permute.xlu1 %990  ;;  %v981_v42 = vpop.permute.xlu0 %980  ;;  %v975_v31 = vadd.f32 %v973_v15, %v945_v25  ;;  %v965_v32 = vadd.f32 %v963_v16, %v935_v24 }
 0x1ba   : > { %v982_v61 = vrot.slane %v981_v42, 1  ;;  %v992_v9 = vrot.slane %v991_v41, 1 }
 0x1bc   : > { %v983_v11 = vsel %vm469_vm13, %v981_v42, %v982_v61  ;;  %v993_v27 = vsel %vm469_vm13, %v991_v41, %v992_v9 }
 0x1bd   : > { %v1012_v48 = vpop.permute.xlu1 %1011  ;;  %v1001_v49 = vpop.permute.xlu0 %1000  ;;  %v985_v26 = vadd.f32 %v983_v11, %v955_v14  ;;  %v995_v42 = vadd.f32 %v993_v27, %v965_v32 }
 0x1be   : > { %v1013_v4 = vrot.slane %v1012_v48, 1  ;;  %v1002_v12 = vrot.slane %v1001_v49, 1 }
 0x1c0   : > { %v1014_v19 = vsel %vm501_vm14, %v1012_v48, %v1013_v4  ;;  %v1003_v28 = vsel %vm469_vm13, %v1001_v49, %v1002_v12 }
 0x1c1   : > { %v1032_v2 = vpop.permute.xlu1 %1031  ;;  %v1022_v3 = vpop.permute.xlu0 %1021  ;;  %v1016_v33 = vadd.f32 %v1014_v19, %v985_v26  ;;  %v1005_v43 = vadd.f32 %v1003_v28, %v975_v31 }
 0x1c2   : > { %v1033_v20 = vrot.slane %v1032_v2, 1  ;;  %v1023_v21 = vrot.slane %v1022_v3, 1 }
 0x1c4   : > { %v1034_v37 = vsel %vm501_vm14, %v1032_v2, %v1033_v20  ;;  %v1024_v38 = vsel %vm501_vm14, %v1022_v3, %v1023_v21 }
 0x1c5   : > { %v1052_v17 = vpop.permute.xlu1 %1051  ;;  %v1042_v18 = vpop.permute.xlu0 %1041  ;;  %v1036_v48 = vadd.f32 %v1034_v37, %v1005_v43  ;;  %v1026_v49 = vadd.f32 %v1024_v38, %v995_v42 }
 0x1c6   : > { %v1043_v22 = vrot.slane %v1042_v18, 1  ;;  %v1053_v29 = vrot.slane %v1052_v17, 1 }
 0x1c8   : > { %v1044_v30 = vsel %vm532_vm15, %v1042_v18, %v1043_v22  ;;  %v1054_v45 = vsel %vm532_vm15, %v1052_v17, %v1053_v29 }
 0x1c9   : > { %v1072_v35 = vpop.permute.xlu1 %1071  ;;  %v1062_v36 = vpop.permute.xlu0 %1061  ;;  %v1046_v44 = vadd.f32 %v1044_v30, %v1016_v33  ;;  %v1056_v56 = vadd.f32 %v1054_v45, %v1026_v49 }
 0x1ca   : > { %v1073_v40 = vrot.slane %v1072_v35, 1  ;;  %v1063_v41 = vrot.slane %v1062_v36, 1 }
 0x1cc   : > { %v1074_v46 = vsel %vm563_vm0, %v1072_v35, %v1073_v40  ;;  %v1064_v47 = vsel %vm532_vm15, %v1062_v36, %v1063_v41 }
 0x1cd   : > { %v1076_v50 = vadd.f32 %v1074_v46, %v1046_v44  ;;  %v1092_v51 = vpop.permute.xlu1 %1091  ;;  %v1082_v52 = vpop.permute.xlu0 %1081  ;;  %v1066_v59 = vadd.f32 %v1064_v47, %v1036_v48 }
 0x1ce   : > { %v1093_v54 = vrot.slane %v1092_v51, 1  ;;  %v1083_v55 = vrot.slane %v1082_v52, 1 }
 0x1cf   : > { %v1099_v57 = vadd.f32 %v1098_v10, %v1076_v50 }
 0x1d0   : > { %v1094_v61 = vsel %vm563_vm0, %v1092_v51, %v1093_v54  ;;  %v1084_v0 = vsel %vm563_vm0, %v1082_v52, %v1083_v55 }
 0x1d1   : > { %1104 = vst.msk [vmem:[%s197_s6] ss:$4 sm:$0x7] %vm1787_vm1, %v1099_v57  ;;  %v1096_v1 = vadd.f32 %v1094_v61, %v1066_v59  ;;  %v1086_v63 = vadd.f32 %v1084_v0, %v1056_v56 }
 0x1d3   : > { %v1112_v2 = vadd.f32 %v1111_v60, %v1096_v1  ;;  %v1107_v3 = vadd.f32 %v1106_v62, %v1086_v63 }
 0x1d5   : > { %1287 = vst.msk [vmem:[%s197_s6 + $0x2] ss:$4 sm:$0x7] %vm1787_vm1, %v1112_v2  ;;  %1285 = vst.msk [vmem:[%s197_s6 + $0x1] ss:$4 sm:$0x7] %vm1787_vm1, %v1107_v3 }
 0x1d6 PF: > { %s15_s12 = sadd.s32 1, %s1389_s12  }
 0x1d7   : > { %p12_p5 = scmp.ge.s32.totalorder %s15_s12, 4  }
 0x1d9   :  { %14 = sbr.rel (!%p12_p5) target bundleno = 2 (0x2), region = 75 }
 0x1de   :  { %1136 = vsyncpa [#allocation4], 1 }
 0x1df   :  { %1138 = vsyncpa [#allocation4 + $0x1], 1 }
 0x1e0   :  { %1139 = vsyncpa [#allocation6], 1 }

</bundles_post_ra>
